<compile_context>
chip_gen: v7x
topology: tpu7x:2x2x1
jax: 0.10.0
libtpu: 0.0.40
codegen_flags: <defaults>
</compile_context>

<pallas_src>
import functools

import jax
import jax.numpy as jnp
from jax.experimental import pallas as pl
from jax.experimental.pallas import tpu as pltpu

LN_EPS = 1e-12  # BERT layernorm epsilon


# ----------------------------- helpers (traced inside kernels) ----------------
def _layernorm(x, g, b):
    mu = jnp.mean(x, axis=-1, keepdims=True)
    var = jnp.mean((x - mu) ** 2, axis=-1, keepdims=True)
    return (x - mu) * jax.lax.rsqrt(var + LN_EPS) * g + b


def _gelu(x):
    # TODO(synk): HF BERT uses exact erf-gelu; tanh-gelu kept for Mosaic lowering robustness.
    c = jnp.float32(0.7978845608028654)  # sqrt(2/pi)
    return 0.5 * x * (1.0 + jnp.tanh(c * (x + 0.044715 * x * x * x)))


# ----------------------------- fused encoder + classifier kernel --------------
def _encoder_kernel(clss_ref,                              # scalar-prefetch (SMEM)
                    emb_ref, bias_ref,
                    wqkv_ref, bqkv_ref, wo_ref, vecs_ref,
                    w1_ref, b1_ref, w2_ref,
                    clsw_ref, clsb_ref,
                    out_ref, h_scr, *, num_heads, b_blk):
    """grid = (batch_block, layer).  The activation for one batch block lives in
    VMEM scratch across all layers; on the last layer the [CLS] gather and the
    sigmoid classifier run as an epilogue and only (b_blk, NC) scores leave."""
    bb = pl.program_id(0)
    layer = pl.program_id(1)

    @pl.when(layer == 0)
    def _():
        h_scr[...] = emb_ref[...]                          # (b_blk, S, H) embeddings

    x = h_scr[...]                                         # (b_blk, S, H) f32
    _, S, H = x.shape
    dh = H // num_heads
    scale = jnp.float32(1.0 / (dh ** 0.5))

    x2 = x.reshape(b_blk * S, H)                           # M = b_blk*S rows for the MXU
    xb = x2.astype(jnp.bfloat16)

    # ---- fused QKV projection: one (b_blk*S, H) x (H, 3H) bf16 matmul ----
    qkv = jnp.dot(xb, wqkv_ref[0], preferred_element_type=jnp.float32)
    qkv = qkv + bqkv_ref[...].reshape(-1)
    q = qkv[:, :H] * scale                                 # fold 1/sqrt(dh) once into q
    k = qkv[:, H:2 * H]
    v = qkv[:, 2 * H:]

    def to_heads(t):                                       # (b_blk*S, H) -> (b_blk*NH, S, dh)
        return (t.reshape(b_blk, S, num_heads, dh)
                 .transpose(0, 2, 1, 3)
                 .reshape(b_blk * num_heads, S, dh)
                 .astype(jnp.bfloat16))

    qh, kh, vh = to_heads(q), to_heads(k), to_heads(v)

    s = jnp.einsum('hqd,hkd->hqk', qh, kh,
                   preferred_element_type=jnp.float32)     # (b_blk*NH, S, S)
    bias = bias_ref[...]                                   # (b_blk, 1, S) additive key mask
    s = s.reshape(b_blk, num_heads, S, S) + bias[:, :, None, :]
    s = s - jnp.max(s, axis=-1, keepdims=True)
    p = jnp.exp(s)
    p = p * pl.reciprocal(jnp.sum(p, axis=-1, keepdims=True), approx=True)
    p3 = p.reshape(b_blk * num_heads, S, S).astype(jnp.bfloat16)

    ctx = jnp.einsum('hqk,hkd->hqd', p3, vh,
                     preferred_element_type=jnp.float32)   # (b_blk*NH, S, dh)
    ctx = (ctx.reshape(b_blk, num_heads, S, dh)
              .transpose(0, 2, 1, 3)
              .reshape(b_blk * S, H))

    vecs = vecs_ref[...].reshape(6, H)                     # packed bias / LN vectors
    attn = jnp.dot(ctx.astype(jnp.bfloat16), wo_ref[0],
                   preferred_element_type=jnp.float32) + vecs[0]

    # residual + LayerNorm 1
    x1 = _layernorm(x2 + attn, vecs[1], vecs[2])

    # feed-forward (bf16 MXU)
    ff = jnp.dot(x1.astype(jnp.bfloat16), w1_ref[0],
                 preferred_element_type=jnp.float32) + b1_ref[...].reshape(-1)
    ff = _gelu(ff)
    ff = jnp.dot(ff.astype(jnp.bfloat16), w2_ref[0],
                 preferred_element_type=jnp.float32) + vecs[3]

    # residual + LayerNorm 2
    out2 = _layernorm(x1 + ff, vecs[4], vecs[5])
    h_scr[...] = out2.reshape(b_blk, S, H)

    @pl.when(layer == pl.num_programs(1) - 1)
    def _():
        # fused epilogue: gather [CLS] rows + Linear(H,1) + sigmoid.
        nc = out_ref.shape[2]
        rows = []
        for b in range(b_blk):
            for c in range(nc):
                idx = clss_ref[bb * b_blk + b, c]
                rows.append(h_scr[b, pl.ds(idx, 1), :])    # (1, H)
        sents = jnp.concatenate(rows, axis=0)              # (b_blk*nc, H)
        score = jnp.sum(sents.reshape(b_blk, nc, H) * clsw_ref[...][None, :, :],
                        axis=-1)                           # (b_blk, nc)
        out_ref[0] = jax.nn.sigmoid(score + clsb_ref[...])


# ----------------------------- wrapper ----------------------------------------
def bert_encoder_classify(emb, attn_bias, enc, cls_w, cls_b, clss,
                          num_heads, num_layers):
    B, S, H = emb.shape
    FFN = enc['w1'].shape[-1]
    NC = clss.shape[1]

    # Batch-block axis: 2 blocks so both v7x TensorCores get work (weights are
    # then streamed at most twice per layer instead of B times); 1 otherwise.
    num_bb = 2 if (B >= 2 and B % 2 == 0) else 1
    b_blk = B // num_bb

    amap = lambda bb, l, clss_ref: (bb, 0, 0)   # batch-block indexed (activations)
    wmap = lambda bb, l, clss_ref: (l, 0, 0)    # layer indexed (weights)
    cmap = lambda bb, l, clss_ref: (0, 0)       # constant (classifier params)

    in_specs = [
        pl.BlockSpec((b_blk, S, H), amap),      # embeddings
        pl.BlockSpec((b_blk, 1, S), amap),      # additive attention bias
        pl.BlockSpec((1, H, 3 * H), wmap),      # fused QKV weight
        pl.BlockSpec((1, 1, 3 * H), wmap),      # fused QKV bias
        pl.BlockSpec((1, H, H), wmap),          # attention output weight
        pl.BlockSpec((1, 6, H), wmap),          # packed bias / LN vectors
        pl.BlockSpec((1, H, FFN), wmap),        # FFN weight 1
        pl.BlockSpec((1, 1, FFN), wmap),        # FFN bias 1
        pl.BlockSpec((1, FFN, H), wmap),        # FFN weight 2
        pl.BlockSpec((1, H), cmap),             # classifier weight (1, H)
        pl.BlockSpec((1, 1), cmap),             # classifier bias  (1, 1)
    ]
    kern = functools.partial(_encoder_kernel, num_heads=num_heads, b_blk=b_blk)
    out = pl.pallas_call(
        kern,
        out_shape=jax.ShapeDtypeStruct((num_bb, b_blk, NC), jnp.float32),
        grid_spec=pltpu.PrefetchScalarGridSpec(
            num_scalar_prefetch=1,              # clss lands in SMEM
            grid=(num_bb, num_layers),
            in_specs=in_specs,
            out_specs=pl.BlockSpec((1, b_blk, NC), amap),
            scratch_shapes=[pltpu.VMEM((b_blk, S, H), jnp.float32)]),
        compiler_params=pltpu.CompilerParams(
            dimension_semantics=("parallel", "arbitrary"),
            # TODO(synk): re-derive for real BERT-base dims: cap ~48-56 MiB on
            # v7x (64 MiB physical); on v5e/v6e (128 MiB) raise further and
            # consider pipeline_mode=pl.Buffered(3) on the w1/w2 streams.
            vmem_limit_bytes=48 * 1024 * 1024),
    )(clss,
      emb, attn_bias,
      enc['wqkv'], enc['bqkv'], enc['wo'], enc['vecs'],
      enc['w1'], enc['b1'], enc['w2'],
      cls_w, cls_b)
    return out.reshape(B, NC)


def _layernorm_jax(x, g, b):
    mu = jnp.mean(x, axis=-1, keepdims=True)
    var = jnp.mean((x - mu) ** 2, axis=-1, keepdims=True)
    return (x - mu) * jax.lax.rsqrt(var + LN_EPS) * g + b


def summarizer_forward(params, x, segs, clss, mask, mask_cls, num_heads):
    # --- Bert.forward: self.model(x, attention_mask=mask, position_ids=segs) ---
    # (per the spec, segs is passed as position_ids; token_type_ids default to 0)
    emb = (params['word_emb'][x]
           + params['pos_emb'][segs]
           + params['type_emb'][0][None, None, :])
    emb = _layernorm_jax(emb, params['emb_ln_g'], params['emb_ln_b'])

    # extended attention mask -> additive bias over keys (BERT convention)
    attn_bias = ((1.0 - mask.astype(jnp.float32)) * -10000.0)[:, None, :]  # (B,1,S)

    num_layers = params['enc']['wqkv'].shape[0]
    # encoder + [CLS] gather + Linear(H,1) + sigmoid, all fused in one kernel
    scores = bert_encoder_classify(emb, attn_bias, params['enc'],
                                   params['cls_w'], params['cls_b'], clss,
                                   num_heads, num_layers)

    # --- Summarizer.forward tail ---
    # sigmoid(.) * mask_cls; masking sents_vec before the linear is redundant
    # because the identical mask multiplies the sigmoid output (0 either way).
    sent_scores = scores * mask_cls.astype(jnp.float32)
    return sent_scores, mask_cls


# ----------------------------- deterministic parameter init --------------------
def init_params(key, vocab, max_pos, hidden, ffn, num_layers):
    std = 0.02
    keys = jax.random.split(key, 8)

    def normal(k, shape, dtype=jnp.float32):
        return (jax.random.normal(k, shape, jnp.float32) * std).astype(dtype)

    L, H, F = num_layers, hidden, ffn
    # packed per-layer H-sized vectors: [attn_out_bias, ln1_g, ln1_b,
    #                                    ffn_out_bias, ln2_g, ln2_b]
    vecs1 = jnp.stack([
        jnp.zeros((H,), jnp.float32),
        jnp.ones((H,), jnp.float32),
        jnp.zeros((H,), jnp.float32),
        jnp.zeros((H,), jnp.float32),
        jnp.ones((H,), jnp.float32),
        jnp.zeros((H,), jnp.float32),
    ], axis=0)                                              # (6, H)

    enc = {
        # matmul weights stored bf16 (MXU-native), biases / LN params f32
        'wqkv': normal(keys[0], (L, H, 3 * H), jnp.bfloat16),   # fused Q|K|V
        'bqkv': jnp.zeros((L, 1, 3 * H), jnp.float32),
        'wo': normal(keys[1], (L, H, H), jnp.bfloat16),
        'vecs': jnp.tile(vecs1[None], (L, 1, 1)),               # (L, 6, H)
        'w1': normal(keys[2], (L, H, F), jnp.bfloat16),
        'b1': jnp.zeros((L, 1, F), jnp.float32),
        'w2': normal(keys[3], (L, F, H), jnp.bfloat16),
    }
    params = {
        'word_emb': normal(keys[4], (vocab, H)),
        'pos_emb': normal(keys[5], (max_pos, H)),
        'type_emb': normal(keys[6], (2, H)),
        'emb_ln_g': jnp.ones((H,), jnp.float32),
        'emb_ln_b': jnp.zeros((H,), jnp.float32),
        'enc': enc,
        # Classifier: nn.Linear(hidden, 1), stored lane-dense as (1, H)
        'cls_w': normal(keys[7], (1, H), jnp.float32),
        'cls_b': jnp.zeros((1, 1), jnp.float32),
    }
    return params


# ----------------------------- main --------------------------------------------
if __name__ == "__main__":
    # small but lane-dense config: H multiple of 256, dh = 128
    B, S, H, NH, FFN, L, V, NC = 2, 16, 256, 2, 512, 2, 64, 4

    key = jax.random.PRNGKey(0)
    kp, kx = jax.random.split(key, 2)
    params = init_params(kp, V, S, H, FFN, L)

    x = jax.random.randint(kx, (B, S), 0, V, dtype=jnp.int32)          # token ids
    segs = jnp.broadcast_to(jnp.arange(S, dtype=jnp.int32), (B, S))    # used as position_ids
    mask = jnp.ones((B, S), jnp.int32).at[1, 12:].set(0)               # attention mask
    clss = jnp.array([[0, 4, 8, 12], [0, 3, 6, 9]], dtype=jnp.int32)   # [CLS] positions
    mask_cls = jnp.array([[1, 1, 1, 1], [1, 1, 1, 0]], dtype=jnp.int32)

    fwd = jax.jit(functools.partial(summarizer_forward, num_heads=NH))
    sent_scores, mc = fwd(params, x, segs, clss, mask, mask_cls)
    jax.block_until_ready(sent_scores)
    assert sent_scores.shape == (B, NC)
    assert bool(jnp.all(jnp.isfinite(sent_scores)))
    print("KERNEL_OK")
</pallas_src>

<mosaic_0001>
module attributes {stable_mosaic.version = 11 : i64} {
  func.func @_encoder_kernel(%arg0: i32, %arg1: i32, %arg2: memref<2x4xi32, #tpu.memory_space<smem>>, %arg3: memref<1x16x256xf32, #tpu.memory_space<vmem>>, %arg4: memref<1x1x16xf32, #tpu.memory_space<vmem>>, %arg5: memref<1x256x768xbf16, #tpu.memory_space<vmem>>, %arg6: memref<1x1x768xf32, #tpu.memory_space<vmem>>, %arg7: memref<1x256x256xbf16, #tpu.memory_space<vmem>>, %arg8: memref<1x6x256xf32, #tpu.memory_space<vmem>>, %arg9: memref<1x256x512xbf16, #tpu.memory_space<vmem>>, %arg10: memref<1x1x512xf32, #tpu.memory_space<vmem>>, %arg11: memref<1x512x256xbf16, #tpu.memory_space<vmem>>, %arg12: memref<1x256xf32, #tpu.memory_space<vmem>>, %arg13: memref<1x1xf32, #tpu.memory_space<vmem>>, %arg14: memref<1x1x4xf32, #tpu.memory_space<vmem>>, %arg15: memref<1x16x256xf32, #tpu.memory_space<vmem>>) attributes {dimension_semantics = [#tpu.dimension_semantics<parallel>, #tpu.dimension_semantics<arbitrary>], iteration_bounds = array<i64: 2, 2>, scalar_prefetch = 1 : i64, scratch_operands = 1 : i64, tpu.core_type = #tpu.core_type<tc>, window_params = [{transform_indices = @transform_0, window_bounds = array<i64: 1, 16, 256>}, {transform_indices = @transform_1, window_bounds = array<i64: 1, 1, 16>}, {transform_indices = @transform_2, window_bounds = array<i64: 1, 256, 768>}, {transform_indices = @transform_3, window_bounds = array<i64: 1, 1, 768>}, {transform_indices = @transform_4, window_bounds = array<i64: 1, 256, 256>}, {transform_indices = @transform_5, window_bounds = array<i64: 1, 6, 256>}, {transform_indices = @transform_6, window_bounds = array<i64: 1, 256, 512>}, {transform_indices = @transform_7, window_bounds = array<i64: 1, 1, 512>}, {transform_indices = @transform_8, window_bounds = array<i64: 1, 512, 256>}, {pipeline_mode = #tpu.pipeline_mode<synchronous>, transform_indices = @transform_9, window_bounds = array<i64: 1, 256>}, {pipeline_mode = #tpu.pipeline_mode<synchronous>, transform_indices = @transform_10, window_bounds = array<i64: 1, 1>}, {transform_indices = @transform_11, window_bounds = array<i64: 1, 1, 4>}]} {
    %c0_i32 = arith.constant 0 : i32
    %0 = arith.cmpi eq, %arg1, %c0_i32 : i32
    %1 = arith.extui %0 : i1 to i32
    %c0_i32_0 = arith.constant 0 : i32
    %2 = arith.cmpi ne, %1, %c0_i32_0 : i32
    scf.if %2 {
      %c0_53 = arith.constant 0 : index
      %c0_54 = arith.constant 0 : index
      %c0_55 = arith.constant 0 : index
      %158 = vector.load %arg3[%c0_53, %c0_54, %c0_55] : memref<1x16x256xf32, #tpu.memory_space<vmem>>, vector<1x16x256xf32>
      %c0_56 = arith.constant 0 : index
      %c0_57 = arith.constant 0 : index
      %c0_58 = arith.constant 0 : index
      %159 = vector.load %arg15[%c0_56, %c0_57, %c0_58] : memref<1x16x256xf32, #tpu.memory_space<vmem>>, vector<1x16x256xf32>
      tpu.vector_store %arg15[%c0_56, %c0_57, %c0_58], %158 {strides = array<i32>} : memref<1x16x256xf32, #tpu.memory_space<vmem>>, vector<1x16x256xf32>,
    } else {
    }
    %c0 = arith.constant 0 : index
    %c0_1 = arith.constant 0 : index
    %c0_2 = arith.constant 0 : index
    %3 = vector.load %arg15[%c0, %c0_1, %c0_2] : memref<1x16x256xf32, #tpu.memory_space<vmem>>, vector<1x16x256xf32>
    %4 = vector.shape_cast %3 : vector<1x16x256xf32> to vector<16x256xf32>
    %5 = arith.truncf %4 : vector<16x256xf32> to vector<16x256xbf16>
    %c0_3 = arith.constant 0 : index
    %c0_4 = arith.constant 0 : index
    %c0_5 = arith.constant 0 : index
    %6 = vector.load %arg5[%c0_3, %c0_4, %c0_5] : memref<1x256x768xbf16, #tpu.memory_space<vmem>>, vector<1x256x768xbf16>
    %7 = vector.shape_cast %6 : vector<1x256x768xbf16> to vector<256x768xbf16>
    %cst = arith.constant dense<0.000000e+00> : vector<16x768xf32>
    %8 = tpu.matmul %5, %7, %cst {dimension_numbers = #tpu.dot_dimension_numbers<[1], [0], [0], [1], [0, 0, 1, 1], [], []>} : vector<16x256xbf16>, vector<256x768xbf16>, vector<16x768xf32> -> vector<16x768xf32>
    %c0_6 = arith.constant 0 : index
    %c0_7 = arith.constant 0 : index
    %c0_8 = arith.constant 0 : index
    %9 = vector.load %arg6[%c0_6, %c0_7, %c0_8] : memref<1x1x768xf32, #tpu.memory_space<vmem>>, vector<1x1x768xf32>
    %10 = vector.shape_cast %9 : vector<1x1x768xf32> to vector<768xf32>
    %11 = vector.shape_cast %10 : vector<768xf32> to vector<1x768xf32>
    %12 = vector.broadcast %11 : vector<1x768xf32> to vector<16x768xf32>
    %13 = arith.addf %8, %12 : vector<16x768xf32>
    %14 = vector.extract_strided_slice %13 {offsets = [0, 0], sizes = [16, 256], strides = [1, 1]} : vector<16x768xf32> to vector<16x256xf32>
    %cst_9 = arith.constant 0.0883883461 : f32
    %15 = vector.broadcast %cst_9 : f32 to vector<16x256xf32>
    %16 = arith.mulf %14, %15 : vector<16x256xf32>
    %17 = vector.extract_strided_slice %13 {offsets = [0, 256], sizes = [16, 256], strides = [1, 1]} : vector<16x768xf32> to vector<16x256xf32>
    %18 = vector.extract_strided_slice %13 {offsets = [0, 512], sizes = [16, 256], strides = [1, 1]} : vector<16x768xf32> to vector<16x256xf32>
    %19 = vector.shape_cast %16 : vector<16x256xf32> to vector<1x16x2x128xf32>
    %20 = tpu.transpose %19, [0, 2, 1, 3] : vector<1x16x2x128xf32> -> vector<1x2x16x128xf32>
    %21 = vector.shape_cast %20 : vector<1x2x16x128xf32> to vector<2x16x128xf32>
    %22 = arith.truncf %21 : vector<2x16x128xf32> to vector<2x16x128xbf16>
    %23 = vector.shape_cast %17 : vector<16x256xf32> to vector<1x16x2x128xf32>
    %24 = tpu.transpose %23, [0, 2, 1, 3] : vector<1x16x2x128xf32> -> vector<1x2x16x128xf32>
    %25 = vector.shape_cast %24 : vector<1x2x16x128xf32> to vector<2x16x128xf32>
    %26 = arith.truncf %25 : vector<2x16x128xf32> to vector<2x16x128xbf16>
    %27 = vector.shape_cast %18 : vector<16x256xf32> to vector<1x16x2x128xf32>
    %28 = tpu.transpose %27, [0, 2, 1, 3] : vector<1x16x2x128xf32> -> vector<1x2x16x128xf32>
    %29 = vector.shape_cast %28 : vector<1x2x16x128xf32> to vector<2x16x128xf32>
    %30 = arith.truncf %29 : vector<2x16x128xf32> to vector<2x16x128xbf16>
    "tpu.trace_start"() <{level = 10 : i32, message = "hqd,hkd->hqk"}> : () -> ()
    %cst_10 = arith.constant dense<0.000000e+00> : vector<2x16x16xf32>
    %31 = tpu.matmul %22, %26, %cst_10 {dimension_numbers = #tpu.dot_dimension_numbers<[2], [2], [1], [1], [0, 0, 0, 1, 1, 1], [0], [0]>} : vector<2x16x128xbf16>, vector<2x16x128xbf16>, vector<2x16x16xf32> -> vector<2x16x16xf32>
    "tpu.trace_stop"() : () -> ()
    %c0_11 = arith.constant 0 : index
    %c0_12 = arith.constant 0 : index
    %c0_13 = arith.constant 0 : index
    %32 = vector.load %arg4[%c0_11, %c0_12, %c0_13] : memref<1x1x16xf32, #tpu.memory_space<vmem>>, vector<1x1x16xf32>
    %33 = vector.shape_cast %31 : vector<2x16x16xf32> to vector<1x2x16x16xf32>
    %34 = vector.shape_cast %32 : vector<1x1x16xf32> to vector<1x1x1x16xf32>
    %35 = vector.broadcast %34 : vector<1x1x1x16xf32> to vector<1x2x16x16xf32>
    %36 = arith.addf %33, %35 : vector<1x2x16x16xf32>
    %cst_14 = arith.constant dense<0xFF800000> : vector<1x2x16xf32>
    %37 = vector.multi_reduction <maximumf>, %36, %cst_14 [3] : vector<1x2x16x16xf32> to vector<1x2x16xf32>
    %38 = vector.shape_cast %37 : vector<1x2x16xf32> to vector<1x2x16x1xf32>
    %39 = vector.broadcast %38 : vector<1x2x16x1xf32> to vector<1x2x16x16xf32>
    %40 = arith.subf %36, %39 : vector<1x2x16x16xf32>
    %41 = math.exp %40 : vector<1x2x16x16xf32>
    %cst_15 = arith.constant dense<0.000000e+00> : vector<1x2x16xf32>
    %42 = vector.multi_reduction <add>, %41, %cst_15 [3] : vector<1x2x16x16xf32> to vector<1x2x16xf32>
    %43 = vector.shape_cast %42 : vector<1x2x16xf32> to vector<1x2x16x1xf32>
    %44 = tpu.reciprocal %43 {approx = true} : vector<1x2x16x1xf32> -> vector<1x2x16x1xf32>
    %45 = vector.broadcast %44 : vector<1x2x16x1xf32> to vector<1x2x16x16xf32>
    %46 = arith.mulf %41, %45 : vector<1x2x16x16xf32>
    %47 = vector.shape_cast %46 : vector<1x2x16x16xf32> to vector<2x16x16xf32>
    %48 = arith.truncf %47 : vector<2x16x16xf32> to vector<2x16x16xbf16>
    "tpu.trace_start"() <{level = 10 : i32, message = "hqk,hkd->hqd"}> : () -> ()
    %cst_16 = arith.constant dense<0.000000e+00> : vector<2x16x128xf32>
    %49 = tpu.matmul %48, %30, %cst_16 {dimension_numbers = #tpu.dot_dimension_numbers<[2], [1], [1], [2], [0, 0, 0, 1, 1, 2], [0], [0]>} : vector<2x16x16xbf16>, vector<2x16x128xbf16>, vector<2x16x128xf32> -> vector<2x16x128xf32>
    "tpu.trace_stop"() : () -> ()
    %50 = vector.shape_cast %49 : vector<2x16x128xf32> to vector<1x2x16x128xf32>
    %51 = tpu.transpose %50, [0, 2, 1, 3] : vector<1x2x16x128xf32> -> vector<1x16x2x128xf32>
    %52 = vector.shape_cast %51 : vector<1x16x2x128xf32> to vector<16x256xf32>
    %c0_17 = arith.constant 0 : index
    %c0_18 = arith.constant 0 : index
    %c0_19 = arith.constant 0 : index
    %53 = vector.load %arg8[%c0_17, %c0_18, %c0_19] : memref<1x6x256xf32, #tpu.memory_space<vmem>>, vector<1x6x256xf32>
    %54 = vector.shape_cast %53 : vector<1x6x256xf32> to vector<6x256xf32>
    %55 = arith.truncf %52 : vector<16x256xf32> to vector<16x256xbf16>
    %c0_20 = arith.constant 0 : index
    %c0_21 = arith.constant 0 : index
    %c0_22 = arith.constant 0 : index
    %56 = vector.load %arg7[%c0_20, %c0_21, %c0_22] : memref<1x256x256xbf16, #tpu.memory_space<vmem>>, vector<1x256x256xbf16>
    %57 = vector.shape_cast %56 : vector<1x256x256xbf16> to vector<256x256xbf16>
    %cst_23 = arith.constant dense<0.000000e+00> : vector<16x256xf32>
    %58 = tpu.matmul %55, %57, %cst_23 {dimension_numbers = #tpu.dot_dimension_numbers<[1], [0], [0], [1], [0, 0, 1, 1], [], []>} : vector<16x256xbf16>, vector<256x256xbf16>, vector<16x256xf32> -> vector<16x256xf32>
    %59 = vector.extract_strided_slice %54 {offsets = [0, 0], sizes = [1, 256], strides = [1, 1]} : vector<6x256xf32> to vector<1x256xf32>
    %60 = vector.shape_cast %59 : vector<1x256xf32> to vector<256xf32>
    %61 = vector.shape_cast %60 : vector<256xf32> to vector<1x256xf32>
    %62 = vector.broadcast %61 : vector<1x256xf32> to vector<16x256xf32>
    %63 = arith.addf %58, %62 : vector<16x256xf32>
    %64 = arith.addf %4, %63 : vector<16x256xf32>
    %65 = vector.extract_strided_slice %54 {offsets = [1, 0], sizes = [1, 256], strides = [1, 1]} : vector<6x256xf32> to vector<1x256xf32>
    %66 = vector.shape_cast %65 : vector<1x256xf32> to vector<256xf32>
    %67 = vector.extract_strided_slice %54 {offsets = [2, 0], sizes = [1, 256], strides = [1, 1]} : vector<6x256xf32> to vector<1x256xf32>
    %68 = vector.shape_cast %67 : vector<1x256xf32> to vector<256xf32>
    %cst_24 = arith.constant dense<0.000000e+00> : vector<16xf32>
    %69 = vector.multi_reduction <add>, %64, %cst_24 [1] : vector<16x256xf32> to vector<16xf32>
    %70 = vector.shape_cast %69 : vector<16xf32> to vector<16x1xf32>
    %cst_25 = arith.constant 2.560000e+02 : f32
    %71 = vector.broadcast %cst_25 : f32 to vector<16x1xf32>
    %72 = arith.divf %70, %71 : vector<16x1xf32>
    %73 = vector.broadcast %72 : vector<16x1xf32> to vector<16x256xf32>
    %74 = arith.subf %64, %73 : vector<16x256xf32>
    %75 = arith.mulf %74, %74 : vector<16x256xf32>
    %cst_26 = arith.constant dense<0.000000e+00> : vector<16xf32>
    %76 = vector.multi_reduction <add>, %75, %cst_26 [1] : vector<16x256xf32> to vector<16xf32>
    %77 = vector.shape_cast %76 : vector<16xf32> to vector<16x1xf32>
    %cst_27 = arith.constant 2.560000e+02 : f32
    %78 = vector.broadcast %cst_27 : f32 to vector<16x1xf32>
    %79 = arith.divf %77, %78 : vector<16x1xf32>
    %80 = vector.broadcast %72 : vector<16x1xf32> to vector<16x256xf32>
    %81 = arith.subf %64, %80 : vector<16x256xf32>
    %cst_28 = arith.constant 9.99999996E-13 : f32
    %82 = vector.broadcast %cst_28 : f32 to vector<16x1xf32>
    %83 = arith.addf %79, %82 : vector<16x1xf32>
    %84 = math.rsqrt %83 : vector<16x1xf32>
    %85 = vector.broadcast %84 : vector<16x1xf32> to vector<16x256xf32>
    %86 = arith.mulf %81, %85 : vector<16x256xf32>
    %87 = vector.shape_cast %66 : vector<256xf32> to vector<1x256xf32>
    %88 = vector.broadcast %87 : vector<1x256xf32> to vector<16x256xf32>
    %89 = arith.mulf %86, %88 : vector<16x256xf32>
    %90 = vector.shape_cast %68 : vector<256xf32> to vector<1x256xf32>
    %91 = vector.broadcast %90 : vector<1x256xf32> to vector<16x256xf32>
    %92 = arith.addf %89, %91 : vector<16x256xf32>
    %93 = arith.truncf %92 : vector<16x256xf32> to vector<16x256xbf16>
    %c0_29 = arith.constant 0 : index
    %c0_30 = arith.constant 0 : index
    %c0_31 = arith.constant 0 : index
    %94 = vector.load %arg9[%c0_29, %c0_30, %c0_31] : memref<1x256x512xbf16, #tpu.memory_space<vmem>>, vector<1x256x512xbf16>
    %95 = vector.shape_cast %94 : vector<1x256x512xbf16> to vector<256x512xbf16>
    %cst_32 = arith.constant dense<0.000000e+00> : vector<16x512xf32>
    %96 = tpu.matmul %93, %95, %cst_32 {dimension_numbers = #tpu.dot_dimension_numbers<[1], [0], [0], [1], [0, 0, 1, 1], [], []>} : vector<16x256xbf16>, vector<256x512xbf16>, vector<16x512xf32> -> vector<16x512xf32>
    %c0_33 = arith.constant 0 : index
    %c0_34 = arith.constant 0 : index
    %c0_35 = arith.constant 0 : index
    %97 = vector.load %arg10[%c0_33, %c0_34, %c0_35] : memref<1x1x512xf32, #tpu.memory_space<vmem>>, vector<1x1x512xf32>
    %98 = vector.shape_cast %97 : vector<1x1x512xf32> to vector<512xf32>
    %99 = vector.shape_cast %98 : vector<512xf32> to vector<1x512xf32>
    %100 = vector.broadcast %99 : vector<1x512xf32> to vector<16x512xf32>
    %101 = arith.addf %96, %100 : vector<16x512xf32>
    %cst_36 = arith.constant 5.000000e-01 : f32
    %102 = vector.broadcast %cst_36 : f32 to vector<16x512xf32>
    %103 = arith.mulf %102, %101 : vector<16x512xf32>
    %cst_37 = arith.constant 4.471500e-02 : f32
    %104 = vector.broadcast %cst_37 : f32 to vector<16x512xf32>
    %105 = arith.mulf %104, %101 : vector<16x512xf32>
    %106 = arith.mulf %105, %101 : vector<16x512xf32>
    %107 = arith.mulf %106, %101 : vector<16x512xf32>
    %108 = arith.addf %101, %107 : vector<16x512xf32>
    %cst_38 = arith.constant 0.797884583 : f32
    %109 = vector.broadcast %cst_38 : f32 to vector<16x512xf32>
    %110 = arith.mulf %109, %108 : vector<16x512xf32>
    %111 = math.tanh %110 : vector<16x512xf32>
    %cst_39 = arith.constant 1.000000e+00 : f32
    %112 = vector.broadcast %cst_39 : f32 to vector<16x512xf32>
    %113 = arith.addf %112, %111 : vector<16x512xf32>
    %114 = arith.mulf %103, %113 : vector<16x512xf32>
    %115 = arith.truncf %114 : vector<16x512xf32> to vector<16x512xbf16>
    %c0_40 = arith.constant 0 : index
    %c0_41 = arith.constant 0 : index
    %c0_42 = arith.constant 0 : index
    %116 = vector.load %arg11[%c0_40, %c0_41, %c0_42] : memref<1x512x256xbf16, #tpu.memory_space<vmem>>, vector<1x512x256xbf16>
    %117 = vector.shape_cast %116 : vector<1x512x256xbf16> to vector<512x256xbf16>
    %cst_43 = arith.constant dense<0.000000e+00> : vector<16x256xf32>
    %118 = tpu.matmul %115, %117, %cst_43 {dimension_numbers = #tpu.dot_dimension_numbers<[1], [0], [0], [1], [0, 0, 1, 1], [], []>} : vector<16x512xbf16>, vector<512x256xbf16>, vector<16x256xf32> -> vector<16x256xf32>
    %119 = vector.extract_strided_slice %54 {offsets = [3, 0], sizes = [1, 256], strides = [1, 1]} : vector<6x256xf32> to vector<1x256xf32>
    %120 = vector.shape_cast %119 : vector<1x256xf32> to vector<256xf32>
    %121 = vector.shape_cast %120 : vector<256xf32> to vector<1x256xf32>
    %122 = vector.broadcast %121 : vector<1x256xf32> to vector<16x256xf32>
    %123 = arith.addf %118, %122 : vector<16x256xf32>
    %124 = arith.addf %92, %123 : vector<16x256xf32>
    %125 = vector.extract_strided_slice %54 {offsets = [4, 0], sizes = [1, 256], strides = [1, 1]} : vector<6x256xf32> to vector<1x256xf32>
    %126 = vector.shape_cast %125 : vector<1x256xf32> to vector<256xf32>
    %127 = vector.extract_strided_slice %54 {offsets = [5, 0], sizes = [1, 256], strides = [1, 1]} : vector<6x256xf32> to vector<1x256xf32>
    %128 = vector.shape_cast %127 : vector<1x256xf32> to vector<256xf32>
    %cst_44 = arith.constant dense<0.000000e+00> : vector<16xf32>
    %129 = vector.multi_reduction <add>, %124, %cst_44 [1] : vector<16x256xf32> to vector<16xf32>
    %130 = vector.shape_cast %129 : vector<16xf32> to vector<16x1xf32>
    %cst_45 = arith.constant 2.560000e+02 : f32
    %131 = vector.broadcast %cst_45 : f32 to vector<16x1xf32>
    %132 = arith.divf %130, %131 : vector<16x1xf32>
    %133 = vector.broadcast %132 : vector<16x1xf32> to vector<16x256xf32>
    %134 = arith.subf %124, %133 : vector<16x256xf32>
    %135 = arith.mulf %134, %134 : vector<16x256xf32>
    %cst_46 = arith.constant dense<0.000000e+00> : vector<16xf32>
    %136 = vector.multi_reduction <add>, %135, %cst_46 [1] : vector<16x256xf32> to vector<16xf32>
    %137 = vector.shape_cast %136 : vector<16xf32> to vector<16x1xf32>
    %cst_47 = arith.constant 2.560000e+02 : f32
    %138 = vector.broadcast %cst_47 : f32 to vector<16x1xf32>
    %139 = arith.divf %137, %138 : vector<16x1xf32>
    %140 = vector.broadcast %132 : vector<16x1xf32> to vector<16x256xf32>
    %141 = arith.subf %124, %140 : vector<16x256xf32>
    %cst_48 = arith.constant 9.99999996E-13 : f32
    %142 = vector.broadcast %cst_48 : f32 to vector<16x1xf32>
    %143 = arith.addf %139, %142 : vector<16x1xf32>
    %144 = math.rsqrt %143 : vector<16x1xf32>
    %145 = vector.broadcast %144 : vector<16x1xf32> to vector<16x256xf32>
    %146 = arith.mulf %141, %145 : vector<16x256xf32>
    %147 = vector.shape_cast %126 : vector<256xf32> to vector<1x256xf32>
    %148 = vector.broadcast %147 : vector<1x256xf32> to vector<16x256xf32>
    %149 = arith.mulf %146, %148 : vector<16x256xf32>
    %150 = vector.shape_cast %128 : vector<256xf32> to vector<1x256xf32>
    %151 = vector.broadcast %150 : vector<1x256xf32> to vector<16x256xf32>
    %152 = arith.addf %149, %151 : vector<16x256xf32>
    %153 = vector.shape_cast %152 : vector<16x256xf32> to vector<1x16x256xf32>
    %c0_49 = arith.constant 0 : index
    %c0_50 = arith.constant 0 : index
    %c0_51 = arith.constant 0 : index
    %154 = vector.load %arg15[%c0_49, %c0_50, %c0_51] : memref<1x16x256xf32, #tpu.memory_space<vmem>>, vector<1x16x256xf32>
    tpu.vector_store %arg15[%c0_49, %c0_50, %c0_51], %153 {strides = array<i32>} : memref<1x16x256xf32, #tpu.memory_space<vmem>>, vector<1x16x256xf32>,
    %c1_i32 = arith.constant 1 : i32
    %155 = arith.cmpi eq, %arg1, %c1_i32 : i32
    %156 = arith.extui %155 : i1 to i32
    %c0_i32_52 = arith.constant 0 : i32
    %157 = arith.cmpi ne, %156, %c0_i32_52 : i32
    scf.if %157 {
      %c1_i32_53 = arith.constant 1 : i32
      %158 = arith.muli %arg0, %c1_i32_53 : i32
      %c0_i32_54 = arith.constant 0 : i32
      %159 = arith.addi %158, %c0_i32_54 : i32
      %160 = arith.index_cast %159 : i32 to index
      %c0_55 = arith.constant 0 : index
      %161 = memref.load %arg2[%160, %c0_55] : memref<2x4xi32, #tpu.memory_space<smem>>
      %c0_56 = arith.constant 0 : index
      %162 = arith.index_cast %161 : i32 to index
      %c0_57 = arith.constant 0 : index
      %163 = vector.load %arg15[%c0_56, %162, %c0_57] : memref<1x16x256xf32, #tpu.memory_space<vmem>>, vector<1x1x256xf32>
      %164 = vector.shape_cast %163 : vector<1x1x256xf32> to vector<1x256xf32>
      %c1_i32_58 = arith.constant 1 : i32
      %165 = arith.muli %arg0, %c1_i32_58 : i32
      %c0_i32_59 = arith.constant 0 : i32
      %166 = arith.addi %165, %c0_i32_59 : i32
      %167 = arith.index_cast %166 : i32 to index
      %c1 = arith.constant 1 : index
      %168 = memref.load %arg2[%167, %c1] : memref<2x4xi32, #tpu.memory_space<smem>>
      %c0_60 = arith.constant 0 : index
      %169 = arith.index_cast %168 : i32 to index
      %c0_61 = arith.constant 0 : index
      %170 = vector.load %arg15[%c0_60, %169, %c0_61] : memref<1x16x256xf32, #tpu.memory_space<vmem>>, vector<1x1x256xf32>
      %171 = vector.shape_cast %170 : vector<1x1x256xf32> to vector<1x256xf32>
      %c1_i32_62 = arith.constant 1 : i32
      %172 = arith.muli %arg0, %c1_i32_62 : i32
      %c0_i32_63 = arith.constant 0 : i32
      %173 = arith.addi %172, %c0_i32_63 : i32
      %174 = arith.index_cast %173 : i32 to index
      %c2 = arith.constant 2 : index
      %175 = memref.load %arg2[%174, %c2] : memref<2x4xi32, #tpu.memory_space<smem>>
      %c0_64 = arith.constant 0 : index
      %176 = arith.index_cast %175 : i32 to index
      %c0_65 = arith.constant 0 : index
      %177 = vector.load %arg15[%c0_64, %176, %c0_65] : memref<1x16x256xf32, #tpu.memory_space<vmem>>, vector<1x1x256xf32>
      %178 = vector.shape_cast %177 : vector<1x1x256xf32> to vector<1x256xf32>
      %c1_i32_66 = arith.constant 1 : i32
      %179 = arith.muli %arg0, %c1_i32_66 : i32
      %c0_i32_67 = arith.constant 0 : i32
      %180 = arith.addi %179, %c0_i32_67 : i32
      %181 = arith.index_cast %180 : i32 to index
      %c3 = arith.constant 3 : index
      %182 = memref.load %arg2[%181, %c3] : memref<2x4xi32, #tpu.memory_space<smem>>
      %c0_68 = arith.constant 0 : index
      %183 = arith.index_cast %182 : i32 to index
      %c0_69 = arith.constant 0 : index
      %184 = vector.load %arg15[%c0_68, %183, %c0_69] : memref<1x16x256xf32, #tpu.memory_space<vmem>>, vector<1x1x256xf32>
      %185 = vector.shape_cast %184 : vector<1x1x256xf32> to vector<1x256xf32>
      %186 = tpu.concatenate %164, %171, %178, %185 in 0 : vector<1x256xf32>, vector<1x256xf32>, vector<1x256xf32>, vector<1x256xf32> -> vector<4x256xf32>
      %187 = vector.shape_cast %186 : vector<4x256xf32> to vector<1x4x256xf32>
      %c0_70 = arith.constant 0 : index
      %c0_71 = arith.constant 0 : index
      %188 = vector.load %arg12[%c0_70, %c0_71] : memref<1x256xf32, #tpu.memory_space<vmem>>, vector<1x256xf32>
      %189 = vector.shape_cast %188 : vector<1x256xf32> to vector<1x1x256xf32>
      %190 = vector.broadcast %189 : vector<1x1x256xf32> to vector<1x4x256xf32>
      %191 = arith.mulf %187, %190 : vector<1x4x256xf32>
      %cst_72 = arith.constant dense<0.000000e+00> : vector<1x4xf32>
      %192 = vector.multi_reduction <add>, %191, %cst_72 [2] : vector<1x4x256xf32> to vector<1x4xf32>
      %c0_73 = arith.constant 0 : index
      %c0_74 = arith.constant 0 : index
      %193 = vector.load %arg13[%c0_73, %c0_74] : memref<1x1xf32, #tpu.memory_space<vmem>>, vector<1x1xf32>
      %194 = vector.broadcast %193 : vector<1x1xf32> to vector<1x4xf32>
      %195 = arith.addf %192, %194 : vector<1x4xf32>
      %196 = arith.negf %195 : vector<1x4xf32>
      %197 = math.exp %196 : vector<1x4xf32>
      %cst_75 = arith.constant 1.000000e+00 : f32
      %198 = vector.broadcast %cst_75 : f32 to vector<1x4xf32>
      %199 = arith.addf %198, %197 : vector<1x4xf32>
      %200 = arith.divf %198, %199 : vector<1x4xf32>
      %c0_76 = arith.constant 0 : index
      %c0_77 = arith.constant 0 : index
      %c0_78 = arith.constant 0 : index
      %201 = vector.load %arg14[%c0_76, %c0_77, %c0_78] : memref<1x1x4xf32, #tpu.memory_space<vmem>>, vector<1x1x4xf32>
      %202 = vector.shape_cast %201 : vector<1x1x4xf32> to vector<1x4xf32>
      %203 = vector.shape_cast %200 : vector<1x4xf32> to vector<1x1x4xf32>
      tpu.vector_store %arg14[%c0_76, %c0_77, %c0_78], %203 {strides = array<i32>} : memref<1x1x4xf32, #tpu.memory_space<vmem>>, vector<1x1x4xf32>,
    } else {
    }
    return
  }
  func.func @transform_0(%arg0: i32, %arg1: i32, %arg2: memref<2x4xi32, #tpu.memory_space<smem>>) -> (i32, i32, i32) {
    %c0_i32 = arith.constant 0 : i32
    %c0_i32_0 = arith.constant 0 : i32
    %c0_i32_1 = arith.constant 0 : i32
    return %arg0, %c0_i32, %c0_i32_0 : i32, i32, i32
  }
  func.func @transform_1(%arg0: i32, %arg1: i32, %arg2: memref<2x4xi32, #tpu.memory_space<smem>>) -> (i32, i32, i32) {
    %c0_i32 = arith.constant 0 : i32
    %c0_i32_0 = arith.constant 0 : i32
    %c0_i32_1 = arith.constant 0 : i32
    return %arg0, %c0_i32, %c0_i32_0 : i32, i32, i32
  }
  func.func @transform_2(%arg0: i32, %arg1: i32, %arg2: memref<2x4xi32, #tpu.memory_space<smem>>) -> (i32, i32, i32) {
    %c0_i32 = arith.constant 0 : i32
    %c0_i32_0 = arith.constant 0 : i32
    %c0_i32_1 = arith.constant 0 : i32
    return %arg1, %c0_i32, %c0_i32_0 : i32, i32, i32
  }
  func.func @transform_3(%arg0: i32, %arg1: i32, %arg2: memref<2x4xi32, #tpu.memory_space<smem>>) -> (i32, i32, i32) {
    %c0_i32 = arith.constant 0 : i32
    %c0_i32_0 = arith.constant 0 : i32
    %c0_i32_1 = arith.constant 0 : i32
    return %arg1, %c0_i32, %c0_i32_0 : i32, i32, i32
  }
  func.func @transform_4(%arg0: i32, %arg1: i32, %arg2: memref<2x4xi32, #tpu.memory_space<smem>>) -> (i32, i32, i32) {
    %c0_i32 = arith.constant 0 : i32
    %c0_i32_0 = arith.constant 0 : i32
    %c0_i32_1 = arith.constant 0 : i32
    return %arg1, %c0_i32, %c0_i32_0 : i32, i32, i32
  }
  func.func @transform_5(%arg0: i32, %arg1: i32, %arg2: memref<2x4xi32, #tpu.memory_space<smem>>) -> (i32, i32, i32) {
    %c0_i32 = arith.constant 0 : i32
    %c0_i32_0 = arith.constant 0 : i32
    %c0_i32_1 = arith.constant 0 : i32
    return %arg1, %c0_i32, %c0_i32_0 : i32, i32, i32
  }
  func.func @transform_6(%arg0: i32, %arg1: i32, %arg2: memref<2x4xi32, #tpu.memory_space<smem>>) -> (i32, i32, i32) {
    %c0_i32 = arith.constant 0 : i32
    %c0_i32_0 = arith.constant 0 : i32
    %c0_i32_1 = arith.constant 0 : i32
    return %arg1, %c0_i32, %c0_i32_0 : i32, i32, i32
  }
  func.func @transform_7(%arg0: i32, %arg1: i32, %arg2: memref<2x4xi32, #tpu.memory_space<smem>>) -> (i32, i32, i32) {
    %c0_i32 = arith.constant 0 : i32
    %c0_i32_0 = arith.constant 0 : i32
    %c0_i32_1 = arith.constant 0 : i32
    return %arg1, %c0_i32, %c0_i32_0 : i32, i32, i32
  }
  func.func @transform_8(%arg0: i32, %arg1: i32, %arg2: memref<2x4xi32, #tpu.memory_space<smem>>) -> (i32, i32, i32) {
    %c0_i32 = arith.constant 0 : i32
    %c0_i32_0 = arith.constant 0 : i32
    %c0_i32_1 = arith.constant 0 : i32
    return %arg1, %c0_i32, %c0_i32_0 : i32, i32, i32
  }
  func.func @transform_9(%arg0: i32, %arg1: i32, %arg2: memref<2x4xi32, #tpu.memory_space<smem>>) -> (i32, i32) {
    %c0_i32 = arith.constant 0 : i32
    %c0_i32_0 = arith.constant 0 : i32
    %c0_i32_1 = arith.constant 0 : i32
    return %c0_i32, %c0_i32_0 : i32, i32
  }
  func.func @transform_10(%arg0: i32, %arg1: i32, %arg2: memref<2x4xi32, #tpu.memory_space<smem>>) -> (i32, i32) {
    %c0_i32 = arith.constant 0 : i32
    %c0_i32_0 = arith.constant 0 : i32
    %c0_i32_1 = arith.constant 0 : i32
    return %c0_i32, %c0_i32_0 : i32, i32
  }
  func.func @transform_11(%arg0: i32, %arg1: i32, %arg2: memref<2x4xi32, #tpu.memory_space<smem>>) -> (i32, i32, i32) {
    %c0_i32 = arith.constant 0 : i32
    %c0_i32_0 = arith.constant 0 : i32
    %c0_i32_1 = arith.constant 0 : i32
    return %arg0, %c0_i32, %c0_i32_0 : i32, i32, i32
  }
}

</mosaic_0001>

<bundles_post_ra>
// kernel: summarizer_forward.1
= control target key start
LH: loop header
LB: loop body
LE: loop exit
PB: predicated region body
PF: predicated region fallthrough
CT: control target
= control target key end

     0   :  { %s6346_s0 = inlined_call_operand.vmem [shape: s32[2,4], index: 0, kind: input, shape index: {}]   ;;  %s6347_s1 = inlined_call_operand.vmem [shape: f32[2,16,256], index: 1, kind: input, shape index: {}]   ;;  %s6348_s2 = inlined_call_operand.vmem [shape: f32[2,1,16], index: 2, kind: input, shape index: {}]   ;;  %s6349_s3 = inlined_call_operand.vmem [shape: bf16[2,256,768], index: 3, kind: input, shape index: {}]   ;;  %s6350_s4 = inlined_call_operand.vmem [shape: f32[2,1,768], index: 4, kind: input, shape index: {}]   ;;  %s6351_s5 = inlined_call_operand.hbm [shape: bf16[2,256,256], index: 5, kind: input, shape index: {}]   ;;  %s6352_s6 = inlined_call_operand.vmem [shape: f32[2,6,256], index: 6, kind: input, shape index: {}]   ;;  %s6353_s7 = inlined_call_operand.hbm [shape: bf16[2,256,512], index: 7, kind: input, shape index: {}]   ;;  %s6354_s8 = inlined_call_operand.vmem [shape: f32[2,1,512], index: 8, kind: input, shape index: {}]   ;;  %s6355_s9 = inlined_call_operand.hbm [shape: bf16[2,512,256], index: 9, kind: input, shape index: {}]   ;;  %s6356_s10 = inlined_call_operand.vmem [shape: f32[1,256], index: 10, kind: input, shape index: {}]   ;;  %s6357_s12 = inlined_call_operand.vmem [shape: f32[2,1,4], index: 12, kind: output, shape index: {}]   ;;  %s6358_s11 = inlined_call_operand.<no memory space> [shape: f32[1,1], index: 11, kind: input, shape index: {}]  }
   0x1   :  { %6368 = sst [smem:[#allocation21_spill]] %s6347_s1  ;;  %s17_s23 = sshll.u32 %s6346_s0, 4  ;;  %v21_v0 = vstv %s6358_s11  ;;  %s18_s23 = int_to_ptr.vmem [resolvable:$true] %s17_s23 }
   0x2   :  { %6369 = sst [smem:[#allocation22_spill]] %s6349_s3  ;;  %22 = vst [vmem:[#allocation5] sm:$0x1] %v21_v0  ;;  %s5180_s26 = scalar_lea.vmem %s18_s23, 32 }
   0x3   :  { %6370 = sst [smem:[#allocation23_spill]] %s6351_s5  ;;  %p5181_p0 = scmp.ne.s32.totalorder %s18_s23, %s5180_s26 }
   0x4   :  { %6371 = sst [smem:[#allocation24_spill]] %s6353_s7  ;;  %p5185_p1 = scmp.lt.s32.totalorder %s18_s23, %s18_s23 }
   0x5   :  { %6372 = sst [smem:[#allocation25_spill]] %s6355_s9  ;;  %p5186_p2 = scmp.lt.s32.totalorder %s5180_s26, %s5180_s26 }
   0x6   :  { %6373 = sst [smem:[#allocation26_spill]] %s6356_s10 }
   0x7   :  { %6374 = sst [smem:[#allocation27_spill]] %s6357_s12  ;;  %p5187_p3 = por %p5186_p2, %p5185_p1 }
   0x9   :  { %p5188_p4 = pnand %p5187_p3, %p5181_p0 }
   0xb   :  { %5191 = shalt.err (!%p5188_p4)  }
   0xc   :  { %s5356_s27 = smov [#allocation4]  }
   0xd   :  { %20 = dma.vmem_to_smem %s18_s23, 32, %s5356_s27, [#allocation3] }
   0xe   :  { %5314 = dma.done.wait [#allocation3], 32 }
   0xf   :  { %5315 = vsyncadd [#allocation3], 4294967264 }
  0x10   :  { %24 = sfence }
  0x11   :  { %25 = vsyncpa [#allocation7], 0 }
  0x12   :  { %27 = vsyncpa [#allocation7 + $0x1], 0 }
  0x13   :  { %28 = vsyncpa [#allocation9], 0 }
  0x14   :  { %30 = vsyncpa [#allocation9 + $0x1], 0  ;;  %s5440_s0 = smov 0   ;;  %s5442_s11 = smov 0  }
  0x15   :  { %s5444_s28 = smov 0   ;;  %s5446_s29 = smov 0  }
  0x16   :  { %s5448_s30 = smov 0   ;;  %s5450_s13 = smov 0  }
  0x17   :  { %s5452_s14 = smov 0   ;;  %s5454_s15 = smov 0  }
  0x18 LB: > { %6375 = sst [smem:[#allocation14_spill]] %s5330_s11  ;;  %s6359_s16 = sadd.s32 4294967295, %s5354_s15   ;;  %s5354_s15 = sphi %s5454_s15, %s36_s15   ;;  %s5350_s14 = sphi %s5452_s14, %s6406_s14   ;;  %s5346_s13 = sphi %s5450_s13, %s6405_s13   ;;  %s5342_s30 = sphi %s5448_s30, %s6404_s30   ;;  %s5338_s29 = sphi %s5446_s29, %s6403_s29   ;;  %s5334_s28 = sphi %s5444_s28, %s6402_s28   ;;  %s5330_s11 = sphi %s5442_s11, %s6401_s11   ;;  %s5326_s0 = sphi %s5440_s0, %s6400_s0  }
  0x19   : > { %6376 = sst [smem:[#allocation15_spill]] %s5334_s28  ;;  %s45_s17 = sadd.s32 1, %s5346_s13 }
  0x1a   : > { %6377 = sst [smem:[#allocation16_spill]] %s5346_s13  ;;  %p46_p5 = scmp.ge.s32.totalorder %s45_s17, 2 }
  0x1b   : > { %6378 = sst [smem:[#allocation17_spill]] %s5350_s14  ;;  %s48_s18 = sadd.s32 1, %s5350_s14 }
  0x1c   : > { %s159_s19 = sadd.s32 1, %s5334_s28  ;;  %p166_p6 = scmp.ne.s32.totalorder %s5334_s28, %s5330_s11 }
  0x1d   : > { %s6408_s17 = smov (%p46_p5, %s45_s17), 0  ;;  %s6410_s18 = smov (!%p46_p5, %s48_s18), %s5350_s14 }
  0x1e   : > { %6379 = sst [smem:[#allocation18_spill]] %s6408_s17  ;;  %s156_s20 = ssub.s32 %s5346_s13, %s6408_s17 }
  0x1f   : > { %p167_p7 = scmp.eq.s32.totalorder %s5354_s15, 0  ;;  %p50_p8 = scmp.ge.s32.totalorder %s6410_s18, 2 }
  0x20   : > { %p157_p9 = scmp.eq.s32.totalorder %s156_s20, 0  ;;  %p172_p11 = scmp.ne.s32.totalorder %s5330_s11, %s5326_s0 }
  0x21   : > { %p168_p10 = por %p167_p7, %p166_p6  ;;  %s6412_s18 = smov (%p50_p8, %s6410_s18), 0 }
  0x22   : > { %6380 = sst [smem:[#allocation19_spill]] %s6412_s18  ;;  %p173_p12 = scmp.eq.s32.totalorder %s6359_s16, 0 }
  0x23   : > { %s5494_s21 = scalar_select %p157_p9, %s5334_s28, %s159_s19  }
  0x24   : > { %p4672_p13 = scmp.lt.s32.totalorder %s5354_s15, 4  ;;  %s5500_s22 = sand.u32 1, %s5334_s28  }
  0x25   : > { %6381 = sst [smem:[#allocation20_spill]] %s5494_s21  ;;  %p5502_p0 = por %p173_p12, %p172_p11 }
  0x26   : > { %s432_s24 = sand.u32 1, %s5354_s15   ;;  %p5507_p1 = pnand %p4672_p13, %p168_p10 }
  0x27   : > { %s6382_s23 = scalar_select %p5502_p0, 1, 0 }
  0x28   : > { %s6362_s26 = sshll.u32 %s5500_s22, 9  ;;  %s6363_s27 = sshll.u32 %s5346_s13, 13 }
  0x29   : > { %s6384_s7 = sld [smem:[#allocation24_spill]]  ;;  %s436_s16 = scalar_lea.vmem [#allocation8], %s6362_s26 }
  0x2a   : > { %s443_s18 = sshll.u32 %s436_s16, 4  ;;  %s5524_s17 = scalar_lea.sflag [#allocation9], %s432_s24  ;;  %s5522_s18 = int_to_ptr.vmem [resolvable:$true] %s443_s18 }
  0x2b   : > { %p5530_p3 = pneg %p5507_p1 }
  0x2f   : > { %s5518_s20 = scalar_lea.hbm %s6384_s7, %s6363_s27  ;;  %s5197_s26 = scalar_lea.hbm %s6384_s7, 16384 }
  0x30   : > { %s5192_s14 = scalar_lea.hbm %s5518_s20, 8192  ;;  %p5198_p6 = scmp.lt.u32.totalorder %s5518_s20, %s6384_s7 }
  0x31   : > { %p5193_p2 = scmp.ne.s32.totalorder %s5518_s20, %s5192_s14  ;;  %p5199_p7 = scmp.lt.u32.totalorder %s5197_s26, %s5192_s14 }
  0x32   : > { %p5201_p9 = scmp.lt.u32.totalorder %s5192_s14, %s5518_s20 }
  0x33   : > { %p5195_p4 = pnand %p5530_p3, %p5193_p2  ;;  %p5200_p8 = por %p5199_p7, %p5198_p6 }
  0x35   : > { %p5196_p5 = pneg %p5195_p4  ;;  %p5202_p10 = por %p5201_p9, %p5200_p8 }
  0x37   : > { %p5203_p11 = pnand %p5202_p10, %p5196_p5 }
  0x39   : > { %5206 = shalt.err (!%p5203_p11)
}
  0x3a   : > { %s5207_s24 = scalar_lea.vmem %s5522_s18, 8192  ;;  %s5357_s0 = smov [#allocation8]  }
  0x3b   : > { %p5208_p12 = scmp.ne.s32.totalorder %s5522_s18, %s5207_s24  ;;  %s5212_s19 = sshll.u32 %s5357_s0, 4  ;;  %s5213_s19 = int_to_ptr.vmem [resolvable:$false] %s5212_s19 }
  0x3c   : > { %s5214_s27 = scalar_lea.vmem %s5213_s19, 16384  ;;  %p5215_p4 = scmp.lt.s32.totalorder %s5522_s18, %s5213_s19 }
  0x3d   : > { %p5210_p13 = pnand %p5208_p12, %p5530_p3  ;;  %p5216_p0 = scmp.lt.s32.totalorder %s5214_s27, %s5207_s24 }
  0x3f   : > { %p5211_p2 = pneg %p5210_p13  ;;  %p5217_p6 = por %p5216_p0, %p5215_p4 }
  0x41   : > { %p5218_p7 = pnand %p5217_p6, %p5211_p2 }
  0x43   : > { %5221 = shalt.err (!%p5218_p7)
}
  0x44   : > { %s5358_s14 = smov 256   ;;  %s5359_s26 = smov 16  }
  0x45   : > { %4668 = dma.hbm_to_vmem [thread:$0]  (!%p5507_p1), %s5518_s20, 8192, %s5522_s18, %s5524_s17, %s5358_s14, %s5358_s14, %s5359_s26  }
  0x46   : > { %s6386_s16 = sshll.u32 %s5346_s13, 13  ;;  %s6387_s9 = sld [smem:[#allocation25_spill]] }
  0x47   : > { %s6388_s27 = sshll.u32 %s5500_s22, 9  ;;  %p4306_p0 = scmp.ge.s32.totalorder %s5354_s15, 1 }
  0x48   : > { %s464_s7 = scalar_lea.vmem [#allocation10], %s6388_s27  ;;  %p479_p5 = scmp.lt.s32.totalorder %s5354_s15, 5 }
  0x49   : > { %s471_s28 = sshll.u32 %s464_s7, 4  ;;  %s4297_s12 = sshll.u32 %s5500_s22, 8  ;;  %s5563_s28 = int_to_ptr.vmem [resolvable:$true] %s471_s28 }
  0x4a   : > { %p5567_p8 = pnand %p4306_p0, %p479_p5  ;;  %s4605_s18 = sshll.u32 %s5346_s13, 12 }
  0x4b   : > { %s6390_s5 = sld [smem:[#allocation23_spill]]  ;;  %s407_s7 = scalar_lea.vmem [#allocation6], %s4297_s12 }
  0x4c   : > { %s5559_s19 = scalar_lea.hbm %s6387_s9, %s6386_s16  ;;  %s414_s16 = sshll.u32 %s407_s7, 4  ;;  %s5578_s16 = int_to_ptr.vmem [resolvable:$true] %s414_s16 }
  0x4d   : > { %s6389_s10 = scalar_select %p5567_p8, 1, 0 }
  0x4e   : > { %s404_s24 = scalar_lea.sflag [#allocation7], %s5500_s22 }
  0x51   : > { %s5576_s26 = scalar_lea.hbm %s6390_s5, %s4605_s18  ;;  %s5227_s20 = scalar_lea.hbm %s6390_s5, 8192 }
  0x52   : > { %s5222_s0 = scalar_lea.hbm %s5576_s26, 4096  ;;  %p5228_p12 = scmp.lt.u32.totalorder %s5576_s26, %s6390_s5 }
  0x53   : > { %p5223_p9 = scmp.ne.s32.totalorder %s5576_s26, %s5222_s0  ;;  %p5229_p13 = scmp.lt.u32.totalorder %s5227_s20, %s5222_s0 }
  0x54   : > { %p5231_p4 = scmp.lt.u32.totalorder %s5222_s0, %s5576_s26 }
  0x55   : > { %p5225_p10 = pnand %p5223_p9, %p5530_p3  ;;  %p5230_p2 = por %p5229_p13, %p5228_p12 }
  0x57   : > { %p5226_p11 = pneg %p5225_p10  ;;  %p5232_p6 = por %p5231_p4, %p5230_p2 }
  0x59   : > { %p5233_p7 = pnand %p5232_p6, %p5226_p11 }
  0x5b   : > { %5236 = shalt.err (!%p5233_p7)
}
  0x5c   : > { %s5237_s12 = scalar_lea.vmem %s5578_s16, 4096  ;;  %s5360_s13 = smov [#allocation6]  }
  0x5d   : > { %p5238_p0 = scmp.ne.s32.totalorder %s5578_s16, %s5237_s12  ;;  %s5242_s7 = sshll.u32 %s5360_s13, 4  ;;  %s5243_s7 = int_to_ptr.vmem [resolvable:$false] %s5242_s7 }
  0x5e   : > { %s5244_s27 = scalar_lea.vmem %s5243_s7, 8192  ;;  %p5245_p10 = scmp.lt.s32.totalorder %s5578_s16, %s5243_s7 }
  0x5f   : > { %p5240_p5 = pnand %p5238_p0, %p5530_p3  ;;  %p5246_p8 = scmp.lt.s32.totalorder %s5244_s27, %s5237_s12 }
  0x61   : > { %p5241_p9 = pneg %p5240_p5  ;;  %p5247_p12 = por %p5246_p8, %p5245_p10 }
  0x63   : > { %p5248_p13 = pnand %p5247_p12, %p5241_p9 }
  0x65   : > { %5251 = shalt.err (!%p5248_p13)
}
  0x66   : > { %s5361_s0 = smov 128   ;;  %s5362_s20 = smov 8  }
  0x67   : > { %4665 = dma.hbm_to_vmem [thread:$0]  (!%p5507_p1), %s5576_s26, 4096, %s5578_s16, %s404_s24, %s5361_s0, %s5361_s0, %s5362_s20  }
  0x68   : > { %s5252_s18 = scalar_lea.hbm %s5559_s19, 8192  ;;  %s5257_s13 = scalar_lea.hbm %s6387_s9, 16384 }
  0x69   : > { %p5253_p8 = scmp.ne.s32.totalorder %s5559_s19, %s5252_s18  ;;  %p5258_p4 = scmp.lt.u32.totalorder %s5559_s19, %s6387_s9 }
  0x6a   : > { %p5259_p6 = scmp.lt.u32.totalorder %s5257_s13, %s5252_s18  ;;  %p5261_p0 = scmp.lt.u32.totalorder %s5252_s18, %s5559_s19 }
  0x6b   : > { %p5255_p11 = pnand %p5253_p8, %p5530_p3 }
  0x6c   : > { %p5260_p7 = por %p5259_p6, %p5258_p4 }
  0x6d   : > { %p5256_p2 = pneg %p5255_p11 }
  0x6e   : > { %p5262_p5 = por %p5261_p0, %p5260_p7 }
  0x70   : > { %p5263_p9 = pnand %p5262_p5, %p5256_p2 }
  0x72   : > { %5266 = shalt.err (!%p5263_p9)
}
  0x73   : > { %s5267_s22 = scalar_lea.vmem %s5563_s28, 8192  ;;  %s5363_s26 = smov [#allocation10]  }
  0x74   : > { %p5268_p10 = scmp.ne.s32.totalorder %s5563_s28, %s5267_s22  ;;  %s5272_s16 = sshll.u32 %s5363_s26, 4  ;;  %s5273_s16 = int_to_ptr.vmem [resolvable:$false] %s5272_s16 }
  0x75   : > { %s5274_s24 = scalar_lea.vmem %s5273_s16, 16384  ;;  %p5275_p8 = scmp.lt.s32.totalorder %s5563_s28, %s5273_s16 }
  0x76   : > { %p5270_p12 = pnand %p5268_p10, %p5530_p3  ;;  %p5276_p11 = scmp.lt.s32.totalorder %s5274_s24, %s5267_s22 }
  0x78   : > { %p5271_p13 = pneg %p5270_p12  ;;  %p5277_p4 = por %p5276_p11, %p5275_p8 }
  0x7a   : > { %p5278_p6 = pnand %p5277_p4, %p5271_p13 }
  0x7c   : > { %5281 = shalt.err (!%p5278_p6)
}
  0x7d   : > { %4671 = dma.hbm_to_vmem [thread:$0]  (!%p5507_p1), %s5559_s19, 8192, %s5563_s28, %s5524_s17, %s5361_s0, %s5361_s0, %s5362_s20  }
  0x7e   : > { %p6391_p3 = scmp.ne.s32.totalorder %s6389_s10, 0 }
  0x7f   : > { %s485_s21 = sand.u32 (!%p6391_p3), 1, %s5330_s11   ;;  %p6392_p2 = scmp.ne.s32.totalorder (!%p6391_p3), %s6382_s23, 0 }
  0x80   : > { %483 = sbr.rel (%p6391_p3) target bundleno = 2893 (0xb4d), region = 64  ;;  %s4307_s18 = sshll.u32 (!%p6391_p3), %s485_s21, 8 }
  0x81   : > { %s486_s14 = scalar_lea.sflag (!%p6391_p3), [#allocation7], %s485_s21  ;;  %s5635_s12 = scalar_lea.vmem (!%p6391_p3), [#allocation6], %s4307_s18 }
  0x87   : > { %5317 = dma.done.wait (%p6392_p2), %s486_s14, 4096  }
  0x88   : > { %5319 = vsyncadd (%p6392_p2), %s486_s14, 4294963200  ;;  %s6393_s25 = sadd.s32 4294967295, %s5354_s15   ;;  %s4308_s28 = sshll.u32 %s485_s21, 9 }
  0x89   : > { %s494_s13 = sand.u32 1, %s6393_s25   ;;  %s5643_s10 = scalar_lea.vmem [#allocation8], %s4308_s28 }
  0x8a   : > { %s495_s17 = scalar_lea.sflag [#allocation9], %s494_s13 }
  0x8b   : > { %5321 = dma.done.wait (%p6392_p2), %s495_s17, 16384  }
  0x8c   : > { %5323 = vsyncadd (%p6392_p2), %s495_s17, 4294950912  ;;  %p580_p1 = scmp.lt.s32.totalorder %s5342_s30, 1  ;;  %p588_p7 = scmp.lt.s32.totalorder %s5338_s29, 1 }
  0x8d   : > { %s6394_s1 = sld [smem:[#allocation21_spill]]  ;;  %s6395_s3 = sld [smem:[#allocation22_spill]] }
  0x8e   : > { %s5652_s19 = scalar_select %p580_p1, %s5342_s30, 1 }
  0x8f   : > { %s589_s0 = scalar_select %p588_p7, %s5338_s29, 1 }
  0x90   : > { %s4608_s20 = sshll.u32 %s5652_s19, 5  ;;  %p4316_p0 = scmp.ne.s32.totalorder %s5338_s29, 0 }
  0x91   : > { %s4654_s24 = smul.u32 768, %s589_s0  ;;  %s4609_s18 = sshll.u32 %s589_s0, 4 }
  0x92   : > { %s4655_s21 = smul.u32 6, %s589_s0  ;;  %s5671_s9 = scalar_lea.vmem %s6352_s6, %s4609_s18 }
  0x93   : > { %s584_s16 = scalar_lea.vmem %s6394_s1, %s4608_s20  ;;  %s5666_s13 = scalar_lea.vmem %s6395_s3, %s4654_s24 }
  0x94   : > { %s5676_s27 = scalar_lea.vmem %s6350_s4, %s4655_s21  ;;  %s4315_s26 = sshll.u32 %s589_s0, 2  ;;  %v614_v1 = vld [vmem:[%s584_s16] sm:$0xff] (!%p4316_p0)  ;;  %v615_v2 = vld [vmem:[%s584_s16 + $0x8] sm:$0xff] (!%p4316_p0)  ;;  %v616_v3 = vld [vmem:[%s584_s16 + $0x10] sm:$0xff] (!%p4316_p0) }
  0x95   : > { %s5681_s22 = scalar_lea.vmem %s6354_s8, %s4315_s26  ;;  %s6396_s24 = sld [smem:[#allocation27_spill]]  ;;  %618 = vst [vmem:[#allocation2] sm:$0xff] (!%p4316_p0), %v614_v1  ;;  %619 = vst [vmem:[#allocation2 + $0x8] sm:$0xff] (!%p4316_p0), %v615_v2  ;;  %v617_v4 = vld [vmem:[%s584_s16 + $0x18] sm:$0xff] (!%p4316_p0) }
  0x96   : > { %s5687_s3 = scalar_lea.vmem [#allocation10], %s4308_s28  ;;  %613 = sbr.rel (%p4316_p0) target bundleno = 157 (0x9d), region = 80  ;;  %620 = vst [vmem:[#allocation2 + $0x10] sm:$0xff] (!%p4316_p0), %v616_v3  ;;  %621 = vst [vmem:[#allocation2 + $0x18] sm:$0xff] (!%p4316_p0), %v617_v4 }
  0x9b   : > { %s608_s25 = scalar_lea.vmem %s6396_s24, %s5652_s19 }
  0x9d PF: > { %v4747_v5 = vld [vmem:[%s5666_s13 + $0x4] ss:$24 sps:$4 sm:$0xff]   ;;  %v4749_v6 = vld [vmem:[%s5666_s13] ss:$24 sps:$4 sm:$0xff]   ;;  %v4750_v7 = vld [vmem:[%s5666_s13 + $0x34] ss:$24 sps:$4 sm:$0xff]   ;;  %s6397_s11 = scalar_lea.vmem %s6348_s2, %s5652_s19 }
  0x9e   : > { %1236 = vmatprep.subr.bf16.mxu1 %v4747_v5  ;;  %v4752_v8 = vld [vmem:[%s5666_s13 + $0x30] ss:$24 sps:$4 sm:$0xff]   ;;  %v4753_v9 = vld [vmem:[%s5666_s13 + $0x64] ss:$24 sps:$4 sm:$0xff]   ;;  %v4755_v10 = vld [vmem:[%s5666_s13 + $0x60] ss:$24 sps:$4 sm:$0xff]  }
  0x9f   : > { %1237 = vmatpush1.bf16.msra.mxu1 %v4749_v6  ;;  %v4756_v11 = vld [vmem:[%s5666_s13 + $0x94] ss:$24 sps:$4 sm:$0xff]   ;;  %v4758_v12 = vld [vmem:[%s5666_s13 + $0x90] ss:$24 sps:$4 sm:$0xff]   ;;  %v4759_v13 = vld [vmem:[%s5666_s13 + $0xc4] ss:$24 sps:$4 sm:$0xff]  }
  0xa0   : > { %1238 = vmatprep.subr.bf16.mxu1 %v4750_v7  ;;  %v4761_v14 = vld [vmem:[%s5666_s13 + $0xc0] ss:$24 sps:$4 sm:$0xff]   ;;  %v4762_v15 = vld [vmem:[%s5666_s13 + $0xf4] ss:$24 sps:$4 sm:$0xff]   ;;  %v4764_v16 = vld [vmem:[%s5666_s13 + $0xf0] ss:$24 sps:$4 sm:$0xff]  }
  0xa1   : > { %v4765_v17 = vld [vmem:[%s5666_s13 + $0x124] ss:$24 sps:$4 sm:$0xff]   ;;  %v623_v18 = vld [vmem:[#allocation2 + $0x8] sm:$0xff]  ;;  %v4767_v21 = vld [vmem:[%s5666_s13 + $0x120] ss:$24 sps:$4 sm:$0xff]   ;;  %vm5365_vm0 = vmmov 0  }
  0xa2   : > { %v625_v19 = vld [vmem:[#allocation2 + $0x18] sm:$0xff]  ;;  %v4768_v22 = vld [vmem:[%s5666_s13 + $0x154] ss:$24 sps:$4 sm:$0xff]   ;;  %v4770_v23 = vld [vmem:[%s5666_s13 + $0x150] ss:$24 sps:$4 sm:$0xff]   ;;  %vm2164_vm1 = vcmask 130048  }
  0xa3   : > { %1239 = vmatpush1.bf16.msra.mxu1 %v4752_v8  ;;  %v627_v20 = vpack.c.bf16 %v625_v19, %v623_v18  ;;  %v4771_v24 = vld [vmem:[%s5666_s13 + $0x184] ss:$24 sps:$4 sm:$0xff]   ;;  %v4773_v25 = vld [vmem:[%s5666_s13 + $0x180] ss:$24 sps:$4 sm:$0xff]   ;;  %v4774_v26 = vld [vmem:[%s5666_s13 + $0x1b4] ss:$24 sps:$4 sm:$0xff]  }
  0xa4   : > { %1240 = vmatprep.subr.bf16.mxu1 %v4753_v9  ;;  %v4776_v27 = vld [vmem:[%s5666_s13 + $0x1b0] ss:$24 sps:$4 sm:$0xff]   ;;  %v4777_v28 = vld [vmem:[%s5666_s13 + $0x1e4] ss:$24 sps:$4 sm:$0xff]   ;;  %v4779_v29 = vld [vmem:[%s5666_s13 + $0x1e0] ss:$24 sps:$4 sm:$0xff]  }
  0xa5   : > { %1268 = vmatprep.mubr.bf16.mxu1 %v627_v20  ;;  %1354 = vmatprep.mubr.bf16.mxu0 %v627_v20  ;;  %v4780_v30 = vld [vmem:[%s5666_s13 + $0x214] ss:$24 sps:$4 sm:$0xff]   ;;  %v4782_v31 = vld [vmem:[%s5666_s13 + $0x210] ss:$24 sps:$4 sm:$0xff]   ;;  %v4783_v32 = vld [vmem:[%s5666_s13 + $0x244] ss:$24 sps:$4 sm:$0xff]  }
  0xa6   : > { %v4785_v33 = vld [vmem:[%s5666_s13 + $0x240] ss:$24 sps:$4 sm:$0xff]   ;;  %v4786_v34 = vld [vmem:[%s5666_s13 + $0x274] ss:$24 sps:$4 sm:$0xff]   ;;  %v4788_v35 = vld [vmem:[%s5666_s13 + $0x270] ss:$24 sps:$4 sm:$0xff]  }
  0xa7   : > { %1241 = vmatpush1.bf16.msra.mxu1 %v4755_v10  ;;  %v4789_v36 = vld [vmem:[%s5666_s13 + $0x2a4] ss:$24 sps:$4 sm:$0xff]   ;;  %v4791_v37 = vld [vmem:[%s5666_s13 + $0x2a0] ss:$24 sps:$4 sm:$0xff]   ;;  %v4792_v38 = vld [vmem:[%s5666_s13 + $0x2d4] ss:$24 sps:$4 sm:$0xff]  }
  0xa8   : > { %1242 = vmatprep.subr.bf16.mxu1 %v4756_v11  ;;  %v4794_v39 = vld [vmem:[%s5666_s13 + $0x2d0] ss:$24 sps:$4 sm:$0xff]   ;;  %v622_v40 = vld [vmem:[#allocation2] sm:$0xff]  ;;  %v4800_v45 = vld [vmem:[%s5666_s13 + $0x3c] ss:$24 sps:$4 sm:$0xff]   ;;  %v5364_v11 = vmov 0.0  }
  0xa9   : > { %v624_v41 = vld [vmem:[#allocation2 + $0x10] sm:$0xff]  ;;  %v4797_v42 = vld [vmem:[%s5666_s13 + $0xc] ss:$24 sps:$4 sm:$0xff]   ;;  %v4795_v43 = vld [vmem:[%s5666_s13 + $0x8] ss:$24 sps:$4 sm:$0xff]   ;;  %p4592_p5 = scmp.ne.s32.totalorder %s5338_s29, 1 }
  0xaa   : > { %v5724_v44 = vpack.c.bf16 %v624_v41, %v622_v40  ;;  %v4798_v46 = vld [vmem:[%s5666_s13 + $0x38] ss:$24 sps:$4 sm:$0xff]   ;;  %v4803_v47 = vld [vmem:[%s5666_s13 + $0x6c] ss:$24 sps:$4 sm:$0xff]   ;;  %v4801_v48 = vld [vmem:[%s5666_s13 + $0x68] ss:$24 sps:$4 sm:$0xff]  }
  0xab   : > { %1243 = vmatpush1.bf16.msra.mxu1 %v4758_v12  ;;  %v4806_v49 = vld [vmem:[%s5666_s13 + $0x9c] ss:$24 sps:$4 sm:$0xff]   ;;  %v4804_v50 = vld [vmem:[%s5666_s13 + $0x98] ss:$24 sps:$4 sm:$0xff]   ;;  %v4809_v51 = vld [vmem:[%s5666_s13 + $0xcc] ss:$24 sps:$4 sm:$0xff]  }
  0xac   : > { %1244 = vmatprep.subr.bf16.mxu1 %v4759_v13  ;;  %v4807_v52 = vld [vmem:[%s5666_s13 + $0xc8] ss:$24 sps:$4 sm:$0xff]   ;;  %v4812_v53 = vld [vmem:[%s5666_s13 + $0xfc] ss:$24 sps:$4 sm:$0xff]   ;;  %v4810_v54 = vld [vmem:[%s5666_s13 + $0xf8] ss:$24 sps:$4 sm:$0xff]  }
  0xad   : > { %v4815_v55 = vld [vmem:[%s5666_s13 + $0x12c] ss:$24 sps:$4 sm:$0xff]   ;;  %v4813_v56 = vld [vmem:[%s5666_s13 + $0x128] ss:$24 sps:$4 sm:$0xff]   ;;  %v4818_v57 = vld [vmem:[%s5666_s13 + $0x15c] ss:$24 sps:$4 sm:$0xff]  }
  0xae   : > { %v4816_v58 = vld [vmem:[%s5666_s13 + $0x158] ss:$24 sps:$4 sm:$0xff]   ;;  %v4821_v59 = vld [vmem:[%s5666_s13 + $0x18c] ss:$24 sps:$4 sm:$0xff]   ;;  %v4819_v60 = vld [vmem:[%s5666_s13 + $0x188] ss:$24 sps:$4 sm:$0xff]  }
  0xaf   : > { %1245 = vmatpush1.bf16.msra.mxu1 %v4761_v14  ;;  %v4824_v61 = vld [vmem:[%s5666_s13 + $0x1bc] ss:$24 sps:$4 sm:$0xff]   ;;  %v4822_v62 = vld [vmem:[%s5666_s13 + $0x1b8] ss:$24 sps:$4 sm:$0xff]   ;;  %v4827_v63 = vld [vmem:[%s5666_s13 + $0x1ec] ss:$24 sps:$4 sm:$0xff]  }
  0xb0   : > { %1246 = vmatprep.subr.bf16.mxu1 %v4762_v15  ;;  %v4825_v0 = vld [vmem:[%s5666_s13 + $0x1e8] ss:$24 sps:$4 sm:$0xff]   ;;  %v4830_v1 = vld [vmem:[%s5666_s13 + $0x21c] ss:$24 sps:$4 sm:$0xff]   ;;  %v4828_v2 = vld [vmem:[%s5666_s13 + $0x218] ss:$24 sps:$4 sm:$0xff]  }
  0xb1   : > { %v4833_v3 = vld [vmem:[%s5666_s13 + $0x24c] ss:$24 sps:$4 sm:$0xff]   ;;  %v4831_v4 = vld [vmem:[%s5666_s13 + $0x248] ss:$24 sps:$4 sm:$0xff]   ;;  %v4836_v5 = vld [vmem:[%s5666_s13 + $0x27c] ss:$24 sps:$4 sm:$0xff]  }
  0xb2   : > { %v4834_v6 = vld [vmem:[%s5666_s13 + $0x278] ss:$24 sps:$4 sm:$0xff]   ;;  %v4839_v7 = vld [vmem:[%s5666_s13 + $0x2ac] ss:$24 sps:$4 sm:$0xff]   ;;  %v4837_v8 = vld [vmem:[%s5666_s13 + $0x2a8] ss:$24 sps:$4 sm:$0xff]  }
  0xb3   : > { %1247 = vmatpush1.bf16.msra.mxu1 %v4764_v16  ;;  %v4842_v9 = vld [vmem:[%s5666_s13 + $0x2dc] ss:$24 sps:$4 sm:$0xff]   ;;  %v4840_v10 = vld [vmem:[%s5666_s13 + $0x2d8] ss:$24 sps:$4 sm:$0xff]   ;;  %vm4043_vm2 = vcmask (!%p4592_p5), 1040384   ;;  %vm4046_vm3 = vcmask (!%p4592_p5), 1041408  }
  0xb4   : > { %1248 = vmatprep.subr.bf16.mxu1 %v4765_v17  ;;  %v4843_v12 = vld [vmem:[%s5666_s13 + $0x14] ss:$24 sps:$4 sm:$0xff]   ;;  %v4845_v13 = vld [vmem:[%s5666_s13 + $0x10] ss:$24 sps:$4 sm:$0xff]   ;;  %v4846_v14 = vld [vmem:[%s5666_s13 + $0x44] ss:$24 sps:$4 sm:$0xff]  }
  0xb5   : > { %1322 = vmatprep.subr.bf16.mxu0 %v4843_v12  ;;  %v4848_v15 = vld [vmem:[%s5666_s13 + $0x40] ss:$24 sps:$4 sm:$0xff]   ;;  %v4849_v16 = vld [vmem:[%s5666_s13 + $0x74] ss:$24 sps:$4 sm:$0xff]   ;;  %v4851_v17 = vld [vmem:[%s5666_s13 + $0x70] ss:$24 sps:$4 sm:$0xff]  }
  0xb6   : > { %1323 = vmatpush1.bf16.msra.mxu0 %v4845_v13  ;;  %v4852_v18 = vld [vmem:[%s5666_s13 + $0xa4] ss:$24 sps:$4 sm:$0xff]   ;;  %v4854_v19 = vld [vmem:[%s5666_s13 + $0xa0] ss:$24 sps:$4 sm:$0xff]   ;;  %v4885_v40 = vld [vmem:[%s5666_s13 + $0x2b4] ss:$24 sps:$4 sm:$0xff]  }
  0xb7   : > { %1249 = vmatpush1.bf16.msra.mxu1 %v4767_v21  ;;  %1324 = vmatprep.subr.bf16.mxu0 %v4846_v14  ;;  %v4857_v21 = vld [vmem:[%s5666_s13 + $0xd0] ss:$24 sps:$4 sm:$0xff]   ;;  %vm4049_vm4 = vcmask (!%p4592_p5), 1042432   ;;  %vm4066_vm5 = vcmask (!%p4592_p5), 1043456   ;;  %vm4097_vm6 = vcmask (!%p4592_p5), 24576  }
  0xb8   : > { %1250 = vmatprep.subr.bf16.mxu1 %v4768_v22  ;;  %v4858_v22 = vld [vmem:[%s5666_s13 + $0x104] ss:$24 sps:$4 sm:$0xff]   ;;  %v4887_v41 = vld [vmem:[%s5666_s13 + $0x2b0] ss:$24 sps:$4 sm:$0xff]  }
  0xba   : > { %1325 = vmatpush1.bf16.msra.mxu0 %v4848_v15 }
  0xbb   : > { %1251 = vmatpush1.bf16.msra.mxu1 %v4770_v23  ;;  %1326 = vmatprep.subr.bf16.mxu0 %v4849_v16  ;;  %v4860_v23 = vld [vmem:[%s5666_s13 + $0x100] ss:$24 sps:$4 sm:$0xff]  }
  0xbc   : > { %1252 = vmatprep.subr.bf16.mxu1 %v4771_v24  ;;  %v4861_v24 = vld [vmem:[%s5666_s13 + $0x134] ss:$24 sps:$4 sm:$0xff]  }
  0xbe   : > { %1327 = vmatpush1.bf16.msra.mxu0 %v4851_v17 }
  0xbf   : > { %1253 = vmatpush1.bf16.msra.mxu1 %v4773_v25  ;;  %1328 = vmatprep.subr.bf16.mxu0 %v4852_v18  ;;  %v4863_v25 = vld [vmem:[%s5666_s13 + $0x130] ss:$24 sps:$4 sm:$0xff]  }
  0xc0   : > { %1254 = vmatprep.subr.bf16.mxu1 %v4774_v26  ;;  %v4864_v26 = vld [vmem:[%s5666_s13 + $0x164] ss:$24 sps:$4 sm:$0xff]  }
  0xc2   : > { %1329 = vmatpush1.bf16.msra.mxu0 %v4854_v19 }
  0xc3   : > { %1255 = vmatpush1.bf16.msra.mxu1 %v4776_v27  ;;  %v4866_v27 = vld [vmem:[%s5666_s13 + $0x160] ss:$24 sps:$4 sm:$0xff]  }
  0xc4   : > { %1256 = vmatprep.subr.bf16.mxu1 %v4777_v28  ;;  %v4867_v28 = vld [vmem:[%s5666_s13 + $0x194] ss:$24 sps:$4 sm:$0xff]  }
  0xc7   : > { %1257 = vmatpush1.bf16.msra.mxu1 %v4779_v29  ;;  %v4869_v29 = vld [vmem:[%s5666_s13 + $0x190] ss:$24 sps:$4 sm:$0xff]  }
  0xc8   : > { %1258 = vmatprep.subr.bf16.mxu1 %v4780_v30  ;;  %v4870_v30 = vld [vmem:[%s5666_s13 + $0x1c4] ss:$24 sps:$4 sm:$0xff]  }
  0xcb   : > { %1259 = vmatpush1.bf16.msra.mxu1 %v4782_v31  ;;  %v4872_v31 = vld [vmem:[%s5666_s13 + $0x1c0] ss:$24 sps:$4 sm:$0xff]  }
  0xcc   : > { %1260 = vmatprep.subr.bf16.mxu1 %v4783_v32  ;;  %v4873_v32 = vld [vmem:[%s5666_s13 + $0x1f4] ss:$24 sps:$4 sm:$0xff]  }
  0xcf   : > { %1261 = vmatpush1.bf16.msra.mxu1 %v4785_v33  ;;  %v4875_v33 = vld [vmem:[%s5666_s13 + $0x1f0] ss:$24 sps:$4 sm:$0xff]  }
  0xd0   : > { %1262 = vmatprep.subr.bf16.mxu1 %v4786_v34  ;;  %v4876_v34 = vld [vmem:[%s5666_s13 + $0x224] ss:$24 sps:$4 sm:$0xff]  }
  0xd3   : > { %1263 = vmatpush1.bf16.msra.mxu1 %v4788_v35  ;;  %v4878_v35 = vld [vmem:[%s5666_s13 + $0x220] ss:$24 sps:$4 sm:$0xff]  }
  0xd4   : > { %1264 = vmatprep.subr.bf16.mxu1 %v4789_v36  ;;  %v4879_v36 = vld [vmem:[%s5666_s13 + $0x254] ss:$24 sps:$4 sm:$0xff]  }
  0xd7   : > { %1265 = vmatpush1.bf16.msra.mxu1 %v4791_v37  ;;  %v4881_v37 = vld [vmem:[%s5666_s13 + $0x250] ss:$24 sps:$4 sm:$0xff]  }
  0xd8   : > { %1266 = vmatprep.subr.bf16.mxu1 %v4792_v38  ;;  %v4882_v38 = vld [vmem:[%s5666_s13 + $0x284] ss:$24 sps:$4 sm:$0xff]  }
  0xdb   : > { %1267 = vmatpush1.bf16.msra.mxu1 %v4794_v39  ;;  %v4884_v39 = vld [vmem:[%s5666_s13 + $0x280] ss:$24 sps:$4 sm:$0xff]  }
  0xdc   : > { %1279 = vmatprep.subr.bf16.mxu1 %v4797_v42  ;;  %v4888_v42 = vld [vmem:[%s5666_s13 + $0x2e4] ss:$24 sps:$4 sm:$0xff]  }
  0xde   : > { %1269 = vmatmul.mubr.bf16.vlgmr.msra.gmra.mrb[0].mxu1 %v5724_v44 }
  0xdf   : > { %1280 = vmatpush1.bf16.msra.mxu1 %v4795_v43  ;;  %1311 = vmatprep.mubr.bf16.mxu1 %v627_v20  ;;  %v4855_v20 = vld [vmem:[%s5666_s13 + $0xd4] ss:$24 sps:$4 sm:$0xff]   ;;  %v4890_v43 = vld [vmem:[%s5666_s13 + $0x2e0] ss:$24 sps:$4 sm:$0xff]  }
  0xe0   : > { %1281 = vmatprep.subr.bf16.mxu1 %v4800_v45  ;;  %1330 = vmatprep.subr.bf16.mxu0 %v4855_v20  ;;  %v726_v45 = vlaneseq }
  0xe1   : > { %1331 = vmatpush1.bf16.msra.mxu0 %v4857_v21 }
  0xe2   : > { %1332 = vmatprep.subr.bf16.mxu0 %v4858_v22 }
  0xe3   : > { %1282 = vmatpush1.bf16.msra.mxu1 %v4798_v46  ;;  %v5798_v46 = vshrl.u32 %v726_v45, 7 }
  0xe4   : > { %1283 = vmatprep.subr.bf16.mxu1 %v4803_v47 }
  0xe5   : > { %1333 = vmatpush1.bf16.msra.mxu0 %v4860_v23  ;;  %v5801_v47 = vsub.s32 0, %v5798_v46 }
  0xe6   : > { %1334 = vmatprep.subr.bf16.mxu0 %v4861_v24 }
  0xe7   : > { %1284 = vmatpush1.bf16.msra.mxu1 %v4801_v48  ;;  %v5366_v48 = vmov 1983009808  }
  0xe8   : > { %1285 = vmatprep.subr.bf16.mxu1 %v4806_v49  ;;  %v1371_v49 = vunpack.c.l.s4 %v5366_v48 }
  0xe9   : > { %1335 = vmatpush1.bf16.msra.mxu0 %v4863_v25 }
  0xea   : > { %1336 = vmatprep.subr.bf16.mxu0 %v4864_v26 }
  0xeb   : > { %1286 = vmatpush1.bf16.msra.mxu1 %v4804_v50  ;;  %v5804_v50 = vld [vmem:[%s5676_s27] sm:$0x3f] }
  0xec   : > { %1287 = vmatprep.subr.bf16.mxu1 %v4809_v51  ;;  %v729_v51 = vrot.slane %v5804_v50, %v5801_v47 }
  0xed   : > { %1337 = vmatpush1.bf16.msra.mxu0 %v4866_v27 }
  0xee   : > { %1338 = vmatprep.subr.bf16.mxu0 %v4867_v28 }
  0xef   : > { %1288 = vmatpush1.bf16.msra.mxu1 %v4807_v52  ;;  %v1372_v52 = vunpack.c.0.s8 %v1371_v49 }
  0xf0   : > { %1289 = vmatprep.subr.bf16.mxu1 %v4812_v53  ;;  %v5367_v53 = vmov 1934713408  }
  0xf1   : > { %1339 = vmatpush1.bf16.msra.mxu0 %v4869_v29 }
  0xf2   : > { %1340 = vmatprep.subr.bf16.mxu0 %v4870_v30 }
  0xf3   : > { %1290 = vmatpush1.bf16.msra.mxu1 %v4810_v54  ;;  %v1402_v54 = vunpack.c.l.s4 %v5367_v53 }
  0xf4   : > { %1291 = vmatprep.subr.bf16.mxu1 %v4815_v55 }
  0xf5   : > { %1341 = vmatpush1.bf16.msra.mxu0 %v4872_v31 }
  0xf6   : > { %1342 = vmatprep.subr.bf16.mxu0 %v4873_v32 }
  0xf7   : > { %1292 = vmatpush1.bf16.msra.mxu1 %v4813_v56 }
  0xf8   : > { %1293 = vmatprep.subr.bf16.mxu1 %v4818_v57 }
  0xf9   : > { %1343 = vmatpush1.bf16.msra.mxu0 %v4875_v33 }
  0xfa   : > { %1344 = vmatprep.subr.bf16.mxu0 %v4876_v34 }
  0xfb   : > { %1294 = vmatpush1.bf16.msra.mxu1 %v4816_v58  ;;  %v5814_v58 = vsub.s32 %v1372_v52, %v5798_v46 }
  0xfc   : > { %1295 = vmatprep.subr.bf16.mxu1 %v4821_v59 }
  0xfd   : > { %1345 = vmatpush1.bf16.msra.mxu0 %v4878_v35 }
  0xfe   : > { %1346 = vmatprep.subr.bf16.mxu0 %v4879_v36 }
  0xff   : > { %1296 = vmatpush1.bf16.msra.mxu1 %v4819_v60  ;;  %v1403_v60 = vunpack.c.0.s8 %v1402_v54 }
 0x100   : > { %1297 = vmatprep.subr.bf16.mxu1 %v4824_v61 }
 0x101   : > { %1347 = vmatpush1.bf16.msra.mxu0 %v4881_v37 }
 0x102   : > { %1348 = vmatprep.subr.bf16.mxu0 %v4882_v38 }
 0x103   : > { %1298 = vmatpush1.bf16.msra.mxu1 %v4822_v62 }
 0x104   : > { %1299 = vmatprep.subr.bf16.mxu1 %v4827_v63 }
 0x105   : > { %1349 = vmatpush1.bf16.msra.mxu0 %v4884_v39 }
 0x106   : > { %1350 = vmatprep.subr.bf16.mxu0 %v4885_v40 }
 0x107   : > { %1300 = vmatpush1.bf16.msra.mxu1 %v4825_v0 }
 0x108   : > { %1301 = vmatprep.subr.bf16.mxu1 %v4830_v1 }
 0x109   : > { %1351 = vmatpush1.bf16.msra.mxu0 %v4887_v41 }
 0x10a   : > { %1352 = vmatprep.subr.bf16.mxu0 %v4888_v42 }
 0x10b   : > { %1302 = vmatpush1.bf16.msra.mxu1 %v4828_v2 }
 0x10c   : > { %1303 = vmatprep.subr.bf16.mxu1 %v4833_v3 }
 0x10d   : > { %1353 = vmatpush1.bf16.msra.mxu0 %v4890_v43 }
 0x10e   : > { %4622 = vmatprep.subr.bf16.mxu0 %v5364_v11 }
 0x10f   : > { %1304 = vmatpush1.bf16.msra.mxu1 %v4831_v4 }
 0x110   : > { %1305 = vmatprep.subr.bf16.mxu1 %v4836_v5  ;;  %1355 = vmatmul.mubr.bf16.vlgmr.msra.gmra.mrb[0].mxu0 %v5724_v44 }
 0x111   : > { %4624 = vmatprep.mubr.msk.bf16.mxu0 %vm5365_vm0, %v5364_v11 }
 0x113   : > { %1306 = vmatpush1.bf16.msra.mxu1 %v4834_v6 }
 0x114   : > { %1307 = vmatprep.subr.bf16.mxu1 %v4839_v7  ;;  %v5819_v7 = vsub.s32 %v1403_v60, %v5798_v46 }
 0x117   : > { %1308 = vmatpush1.bf16.msra.mxu1 %v4837_v8 }
 0x118   : > { %1309 = vmatprep.subr.bf16.mxu1 %v4842_v9 }
 0x11b   : > { %1310 = vmatpush1.bf16.msra.mxu1 %v4840_v10 }
 0x11c   : > { %4634 = vmatprep.subr.bf16.mxu1 %v5364_v11 }
 0x11e   : > { %1312 = vmatmul.mubr.bf16.vlgmr.msra.gmra.mrb[4].mxu1 %v5724_v44  ;;  %v5807_v44 = vsub.s32 1, %v5798_v46 }
 0x11f   : > { %4636 = vmatprep.mubr.msk.bf16.mxu1 %vm5365_vm0, %v5364_v11 }
 0x120   : > { %v733_v55 = vrot.slane %v5804_v50, %v5807_v44 }
 0x1b1   : > { %v1270_v56 = vpop.f32.mrb[0].mxu1 }
 0x1b2   : > { %v1271_v57 = vadd.f32 %v1270_v56, %v729_v51  ;;  %v1272_v59 = vpop.f32.mrb[1].mxu1 }
 0x1b3   : > { %v1273_v61 = vadd.f32 %v1272_v59, %v733_v55  ;;  %v1274_v62 = vpop.f32.mrb[2].mxu1 }
 0x1b4   : > { %v1365_v63 = vmul.f32 0.088388346, %v1271_v57  ;;  %v1275_v0 = vadd.f32 %v1274_v62, %v729_v51  ;;  %v1276_v1 = vpop.f32.mrb[3].mxu1 }
 0x1b5   : > { %v1366_v2 = vmul.f32 0.088388346, %v1273_v61  ;;  %v1277_v3 = vadd.f32 %v1276_v1, %v733_v55 }
 0x1b6   : > { %v1369_v4 = vcombine.high %v1365_v63, %v5364_v11  ;;  %v1376_v5 = vrot.slane %v1365_v63, %v5814_v58  ;;  %v1367_v6 = vmul.f32 0.088388346, %v1275_v0 }
 0x1b7   : > { %v1384_v8 = vcombine.high %v1366_v2, %v5364_v11  ;;  %v1391_v9 = vrot.slane %v1366_v2, %v5814_v58  ;;  %v1368_v10 = vmul.f32 0.088388346, %v1277_v3 }
 0x1b8   : > { %v1383_v12 = vrot.slane %v1369_v4, %v5814_v58  ;;  %v1435_v13 = vcombine.high %v1367_v6, %v5364_v11  ;;  %v1442_v14 = vrot.slane %v1367_v6, %v5814_v58 }
 0x1b9   : > { %v1398_v15 = vrot.slane %v1384_v8, %v5814_v58  ;;  %v1399_v16 = vcombine.low %v1376_v5, %v1391_v9  ;;  %v1400_v17 = vcombine.high %v1376_v5, %v1391_v9  ;;  %v1450_v18 = vcombine.high %v1368_v10, %v5364_v11 }
 0x1ba   : > { %v1449_v19 = vrot.slane %v1435_v13, %v5814_v58  ;;  %v1457_v20 = vrot.slane %v1368_v10, %v5814_v58  ;;  %v5856_v9 = vsub.s32 2, %v5798_v46  ;;  %v5859_v10 = vsub.s32 3, %v5798_v46 }
 0x1bb   : > { %v1407_v21 = vrot.slane %v1399_v16, %v5819_v7  ;;  %v1414_v22 = vrot.slane %v1400_v17, %v5819_v7  ;;  %v1415_v23 = vcombine.low %v1383_v12, %v1398_v15  ;;  %v1416_v24 = vcombine.high %v1383_v12, %v1398_v15 }
 0x1bc   : > { %v1464_v25 = vrot.slane %v1450_v18, %v5814_v58  ;;  %v1465_v26 = vcombine.low %v1442_v14, %v1457_v20  ;;  %v1466_v27 = vcombine.high %v1442_v14, %v1457_v20  ;;  %v737_v12 = vrot.slane %v5804_v50, %v5856_v9 }
 0x1bd   : > { %v1423_v28 = vrot.slane %v1415_v23, %v5819_v7  ;;  %v1430_v29 = vrot.slane %v1416_v24, %v5819_v7  ;;  %v1501_v30 = vcombine.low %v1407_v21, %v1414_v22  ;;  %v4413_v31 = vcombine.high %v1407_v21, %v1414_v22 }
 0x1be   : > { %v1473_v32 = vrot.slane %v1465_v26, %v5819_v7  ;;  %v1480_v33 = vrot.slane %v1466_v27, %v5819_v7  ;;  %v1481_v34 = vcombine.low %v1449_v19, %v1464_v25  ;;  %v1482_v35 = vcombine.high %v1449_v19, %v1464_v25 }
 0x1bf   : > { %v1508_v36 = vrot.slane %v1501_v30, %v5814_v58  ;;  %v1516_v37 = vrot.slane %v4413_v31, %v5814_v58  ;;  %v1517_v38 = vcombine.low %v1423_v28, %v1430_v29  ;;  %v4414_v39 = vcombine.high %v1423_v28, %v1430_v29 }
 0x1c0   : > { %v1489_v40 = vrot.slane %v1481_v34, %v5819_v7  ;;  %v1496_v41 = vrot.slane %v1482_v35, %v5819_v7  ;;  %v1551_v42 = vcombine.low %v1473_v32, %v1480_v33  ;;  %v4415_v43 = vcombine.high %v1473_v32, %v1480_v33 }
 0x1c1   : > { %v1524_v48 = vrot.slane %v1517_v38, %v5814_v58  ;;  %v1532_v49 = vrot.slane %v4414_v39, %v5814_v58  ;;  %v1533_v51 = vcombine.low %v1508_v36, %v1516_v37  ;;  %v741_v13 = vrot.slane %v5804_v50, %v5859_v10 }
 0x1c2   : > { %v1558_v52 = vrot.slane %v1551_v42, %v5814_v58  ;;  %v1566_v53 = vrot.slane %v4415_v43, %v5814_v58  ;;  %v1567_v54 = vcombine.low %v1489_v40, %v1496_v41  ;;  %v4416_v55 = vcombine.high %v1489_v40, %v1496_v41 }
 0x1c3   : > { %v1541_v56 = vcombine.low %v1524_v48, %v1532_v49  ;;  %v1540_v61 = vrot.slane %v1533_v51, %v5819_v7 }
 0x1c4   : > { %v1574_v57 = vrot.slane %v1567_v54, %v5814_v58  ;;  %v1582_v59 = vrot.slane %v4416_v55, %v5814_v58  ;;  %v1583_v60 = vcombine.low %v1558_v52, %v1566_v53 }
 0x1c5   : > { %v1548_v62 = vrot.slane %v1541_v56, %v5819_v7 }
 0x1c6   : > { %v1591_v63 = vcombine.low %v1574_v57, %v1582_v59  ;;  %v1590_v2 = vrot.slane %v1583_v60, %v5819_v7 }
 0x1c7   : > { %v1549_v0 = vcombine.low %v1540_v61, %v1548_v62  ;;  %v1550_v1 = vcombine.high %v1540_v61, %v1548_v62 }
 0x1c8   : > { %v1598_v3 = vrot.slane %v1591_v63, %v5819_v7 }
 0x1ca   : > { %v1599_v4 = vcombine.low %v1590_v2, %v1598_v3  ;;  %v1600_v5 = vcombine.high %v1590_v2, %v1598_v3 }
 0x1cc   : > { %v5851_v6 = vpack.c.bf16 %v1599_v4, %v1549_v0  ;;  %v5853_v8 = vpack.c.bf16 %v1600_v5, %v1550_v1 }
 0x1f1   : > { %v1313_v14 = vpop.f32.mrb[4].mxu1 }
 0x1f2   : > { %v1314_v15 = vadd.f32 %v1313_v14, %v737_v12  ;;  %v1315_v16 = vpop.f32.mrb[5].mxu1 }
 0x1f3   : > { %v1316_v17 = vadd.f32 %v1315_v16, %v741_v13  ;;  %v1317_v18 = vpop.f32.mrb[6].mxu1 }
 0x1f4   : > { %v1603_v19 = vcombine.high %v1314_v15, %v5364_v11  ;;  %v1610_v20 = vrot.slane %v1314_v15, %v5814_v58  ;;  %v1318_v21 = vadd.f32 %v1317_v18, %v737_v12  ;;  %v1319_v22 = vpop.f32.mrb[7].mxu1 }
 0x1f5   : > { %v1618_v23 = vcombine.high %v1316_v17, %v5364_v11  ;;  %v1625_v24 = vrot.slane %v1316_v17, %v5814_v58  ;;  %v1320_v25 = vadd.f32 %v1319_v22, %v741_v13 }
 0x1f6   : > { %v1617_v26 = vrot.slane %v1603_v19, %v5814_v58  ;;  %v1669_v27 = vcombine.high %v1318_v21, %v5364_v11  ;;  %v1676_v28 = vrot.slane %v1318_v21, %v5814_v58 }
 0x1f7   : > { %v1632_v29 = vrot.slane %v1618_v23, %v5814_v58  ;;  %v1633_v30 = vcombine.low %v1610_v20, %v1625_v24  ;;  %v1634_v31 = vcombine.high %v1610_v20, %v1625_v24  ;;  %v1684_v32 = vcombine.high %v1320_v25, %v5364_v11 }
 0x1f8   : > { %v1683_v33 = vrot.slane %v1669_v27, %v5814_v58  ;;  %v1691_v34 = vrot.slane %v1320_v25, %v5814_v58 }
 0x1f9   : > { %v1641_v35 = vrot.slane %v1633_v30, %v5819_v7  ;;  %v1648_v36 = vrot.slane %v1634_v31, %v5819_v7  ;;  %v1649_v37 = vcombine.low %v1617_v26, %v1632_v29  ;;  %v1650_v38 = vcombine.high %v1617_v26, %v1632_v29 }
 0x1fa   : > { %v1698_v39 = vrot.slane %v1684_v32, %v5814_v58  ;;  %v1699_v40 = vcombine.low %v1676_v28, %v1691_v34  ;;  %v1700_v41 = vcombine.high %v1676_v28, %v1691_v34  ;;  %v5903_v28 = vsub.s32 4, %v5798_v46  ;;  %v1356_v32 = vpop.f32.mrb[0].mxu0 }
 0x1fb   : > { %v1657_v42 = vrot.slane %v1649_v37, %v5819_v7  ;;  %v1664_v43 = vrot.slane %v1650_v38, %v5819_v7  ;;  %v1735_v48 = vcombine.low %v1641_v35, %v1648_v36  ;;  %v4417_v49 = vcombine.high %v1641_v35, %v1648_v36 }
 0x1fc   : > { %v1707_v51 = vrot.slane %v1699_v40, %v5819_v7  ;;  %v1714_v52 = vrot.slane %v1700_v41, %v5819_v7  ;;  %v1715_v53 = vcombine.low %v1683_v33, %v1698_v39  ;;  %v1716_v54 = vcombine.high %v1683_v33, %v1698_v39  ;;  %v1358_v33 = vpop.f32.mrb[1].mxu0 }
 0x1fd   : > { %v1742_v55 = vrot.slane %v1735_v48, %v5814_v58  ;;  %v1750_v56 = vrot.slane %v4417_v49, %v5814_v58  ;;  %v1751_v57 = vcombine.low %v1657_v42, %v1664_v43  ;;  %v4418_v59 = vcombine.high %v1657_v42, %v1664_v43  ;;  %v1360_v35 = vpop.f32.mrb[2].mxu0 }
 0x1fe   : > { %v1723_v60 = vrot.slane %v1715_v53, %v5819_v7  ;;  %v1730_v61 = vrot.slane %v1716_v54, %v5819_v7  ;;  %v1785_v62 = vcombine.low %v1707_v51, %v1714_v52  ;;  %v4419_v63 = vcombine.high %v1707_v51, %v1714_v52  ;;  %v1362_v38 = vpop.f32.mrb[3].mxu0 }
 0x1ff   : > { %v1758_v0 = vrot.slane %v1751_v57, %v5814_v58  ;;  %v1766_v1 = vrot.slane %v4418_v59, %v5814_v58  ;;  %v1767_v2 = vcombine.low %v1742_v55, %v1750_v56  ;;  %v5906_v29 = vsub.s32 5, %v5798_v46 }
 0x200   : > { %v1792_v3 = vrot.slane %v1785_v62, %v5814_v58  ;;  %v1800_v4 = vrot.slane %v4419_v63, %v5814_v58  ;;  %v1801_v5 = vcombine.low %v1723_v60, %v1730_v61  ;;  %v4420_v12 = vcombine.high %v1723_v60, %v1730_v61 }
 0x201   : > { %v1775_v13 = vcombine.low %v1758_v0, %v1766_v1  ;;  %v1774_v17 = vrot.slane %v1767_v2, %v5819_v7  ;;  %v745_v30 = vrot.slane %v5804_v50, %v5903_v28  ;;  %v749_v31 = vrot.slane %v5804_v50, %v5906_v29 }
 0x202   : > { %v1808_v14 = vrot.slane %v1801_v5, %v5814_v58  ;;  %v1816_v15 = vrot.slane %v4420_v12, %v5814_v58  ;;  %v1817_v16 = vcombine.low %v1792_v3, %v1800_v4 }
 0x203   : > { %v1782_v18 = vrot.slane %v1775_v13, %v5819_v7  ;;  %v1359_v34 = vadd.f32 %v1358_v33, %v749_v31  ;;  %v1361_v37 = vadd.f32 %v1360_v35, %v745_v30  ;;  %v1363_v41 = vadd.f32 %v1362_v38, %v749_v31 }
 0x204   : > { %v1825_v19 = vcombine.low %v1808_v14, %v1816_v15  ;;  %v1824_v22 = vrot.slane %v1817_v16, %v5819_v7 }
 0x205   : > { %v1783_v20 = vcombine.low %v1774_v17, %v1782_v18  ;;  %v1784_v21 = vcombine.high %v1774_v17, %v1782_v18  ;;  %v1852_v39 = vcombine.high %v1359_v34, %v5364_v11  ;;  %v1859_v40 = vrot.slane %v1359_v34, %v5814_v58 }
 0x206   : > { %v1832_v23 = vrot.slane %v1825_v19, %v5819_v7  ;;  %v1903_v50 = vcombine.high %v1361_v37, %v5364_v11  ;;  %v1910_v43 = vrot.slane %v1361_v37, %v5814_v58  ;;  %v1918_v52 = vcombine.high %v1363_v41, %v5364_v11 }
 0x207   : > { %v1866_v48 = vrot.slane %v1852_v39, %v5814_v58  ;;  %v1925_v54 = vrot.slane %v1363_v41, %v5814_v58 }
 0x208   : > { %v1833_v24 = vcombine.low %v1824_v22, %v1832_v23  ;;  %v1834_v25 = vcombine.high %v1824_v22, %v1832_v23  ;;  %v1917_v53 = vrot.slane %v1903_v50, %v5814_v58  ;;  %v1932_v60 = vrot.slane %v1918_v52, %v5814_v58  ;;  %v4425_v50 = vld [vmem:[%s6397_s11] ss:$0 sm:$0xff] }
 0x209   : > { %v1933_v61 = vcombine.low %v1910_v43, %v1925_v54  ;;  %v1934_v62 = vcombine.high %v1910_v43, %v1925_v54 }
 0x20a   : > { %v1835_v26 = vpack.c.bf16 %v1833_v24, %v1783_v20  ;;  %v1836_v27 = vpack.c.bf16 %v1834_v25, %v1784_v21  ;;  %v1949_v5 = vcombine.low %v1917_v53, %v1932_v60  ;;  %v1950_v12 = vcombine.high %v1917_v53, %v1932_v60 }
 0x20b   : > { %v1941_v3 = vrot.slane %v1933_v61, %v5819_v7  ;;  %v1948_v4 = vrot.slane %v1934_v62, %v5819_v7 }
 0x20c   : > { %4623 = vmatpush3.bf16.xpose.msra.mxu0 %v1835_v26  ;;  %v1957_v17 = vrot.slane %v1949_v5, %v5819_v7  ;;  %v1964_v18 = vrot.slane %v1950_v12, %v5819_v7 }
 0x20d   : > { %4628 = vmatprep.subr.bf16.mxu0 %v5364_v11  ;;  %v2019_v19 = vcombine.low %v1941_v3, %v1948_v4  ;;  %v4423_v20 = vcombine.high %v1941_v3, %v1948_v4 }
 0x20e   : > { %v2035_v26 = vcombine.low %v1957_v17, %v1964_v18 }
 0x20f   : > { %v2026_v24 = vrot.slane %v2019_v19, %v5814_v58  ;;  %v2034_v25 = vrot.slane %v4423_v20, %v5814_v58 }
 0x213   : > { %4625 = vmatmul.mubr.bf16.vlgmr.msra.gmra.mrb[4].mxu0 %v5851_v6  ;;  %v1357_v6 = vadd.f32 %v1356_v32, %v745_v30  ;;  %v2042_v30 = vrot.slane %v2035_v26, %v5814_v58  ;;  %v2051_v32 = vcombine.low %v2026_v24, %v2034_v25 }
 0x214   : > { %4629 = vmatpush3.bf16.xpose.msra.mxu0 %v1836_v27  ;;  %4630 = vmatprep.mubr.msk.bf16.mxu0 %vm5365_vm0, %v5364_v11  ;;  %v4424_v27 = vcombine.high %v1957_v17, %v1964_v18 }
 0x215   : > { %v1837_v36 = vcombine.high %v1357_v6, %v5364_v11 }
 0x216   : > { %v2050_v31 = vrot.slane %v4424_v27, %v5814_v58 }
 0x217   : > { %v1851_v42 = vrot.slane %v1837_v36, %v5814_v58  ;;  %v2058_v36 = vrot.slane %v2051_v32, %v5819_v7 }
 0x218   : > { %v2059_v33 = vcombine.low %v2042_v30, %v2050_v31 }
 0x219   : > { %v1883_v57 = vcombine.low %v1851_v42, %v1866_v48  ;;  %v1884_v59 = vcombine.high %v1851_v42, %v1866_v48 }
 0x21b   : > { %4631 = vmatmul.mubr.bf16.vlgmr.msra.gmra.mrb[8].mxu0 %v5853_v8  ;;  %v1844_v8 = vrot.slane %v1357_v6, %v5814_v58  ;;  %v1891_v63 = vrot.slane %v1883_v57, %v5819_v7  ;;  %v1898_v0 = vrot.slane %v1884_v59, %v5819_v7 }
 0x21d   : > { %v1867_v49 = vcombine.low %v1844_v8, %v1859_v40  ;;  %v1868_v51 = vcombine.high %v1844_v8, %v1859_v40  ;;  %v1985_v15 = vcombine.low %v1891_v63, %v1898_v0  ;;  %v4422_v16 = vcombine.high %v1891_v63, %v1898_v0 }
 0x21e   : > { %v2066_v8 = vrot.slane %v2059_v33, %v5819_v7 }
 0x21f   : > { %v1875_v55 = vrot.slane %v1867_v49, %v5819_v7  ;;  %v1882_v56 = vrot.slane %v1868_v51, %v5819_v7  ;;  %v1992_v21 = vrot.slane %v1985_v15, %v5814_v58  ;;  %v2000_v22 = vrot.slane %v4422_v16, %v5814_v58 }
 0x220   : > { %v2067_v39 = vcombine.low %v2058_v36, %v2066_v8  ;;  %v2068_v40 = vcombine.high %v2058_v36, %v2066_v8  ;;  %v4893_v8 = vld [vmem:[%s5635_s12 + $0x4] ss:$8 sps:$4 sm:$0xff]  }
 0x221   : > { %v1969_v1 = vcombine.low %v1875_v55, %v1882_v56  ;;  %v4421_v2 = vcombine.high %v1875_v55, %v1882_v56  ;;  %v2009_v6 = vcombine.low %v1992_v21, %v2000_v22 }
 0x223   : > { %v1976_v13 = vrot.slane %v1969_v1, %v5814_v58  ;;  %v1984_v14 = vrot.slane %v4421_v2, %v5814_v58  ;;  %v2016_v35 = vrot.slane %v2009_v6, %v5819_v7 }
 0x225   : > { %v2001_v23 = vcombine.low %v1976_v13, %v1984_v14 }
 0x227   : > { %v2008_v34 = vrot.slane %v2001_v23, %v5819_v7 }
 0x229   : > { %v2017_v37 = vcombine.low %v2008_v34, %v2016_v35  ;;  %v2018_v38 = vcombine.high %v2008_v34, %v2016_v35 }
 0x22b   : > { %v2069_v41 = vpack.c.bf16 %v2067_v39, %v2017_v37  ;;  %v5944_v42 = vpack.c.bf16 %v2068_v40, %v2018_v38 }
 0x22d   : > { %4635 = vmatpush3.bf16.msra.mxu1 %v2069_v41  ;;  %v4891_v41 = vld [vmem:[%s5635_s12] ss:$8 sps:$4 sm:$0xff]  }
 0x22e   : > { %4640 = vmatprep.subr.bf16.mxu1 %v5364_v11 }
 0x2e6   : > { %v2105_v43 = vpop.f32.mrb[4].mxu0 }
 0x2e7   : > { %v2160_v48 = vadd.f32 %v4425_v50, %v2105_v43  ;;  %v4626_v49 = vpop.f32.mrb[5].mxu0  ;;  %v4896_v43 = vld [vmem:[%s5635_s12 + $0x14] ss:$8 sps:$4 sm:$0xff]  }
 0x2e8   : > { %v2108_v51 = vpop.f32.mrb[6].mxu0  ;;  %v4897_v49 = vld [vmem:[%s5635_s12 + $0x20] ss:$8 sps:$4 sm:$0xff]  }
 0x2e9   : > { %v2161_v52 = vadd.f32 %v4425_v50, %v2108_v51  ;;  %v4627_v53 = vpop.f32.mrb[7].mxu0  ;;  %v2165_v54 = vsel %vm2164_vm1, %v2160_v48, -inf  ;;  %v4902_v51 = vld [vmem:[%s5635_s12 + $0x34] ss:$8 sps:$4 sm:$0xff]  }
 0x2ea   : > { %2166 = vmax.xlane.f32.xlu0 %v2165_v54  ;;  %v4905_v53 = vld [vmem:[%s5635_s12 + $0x44] ss:$8 sps:$4 sm:$0xff]   ;;  %v4903_v54 = vld [vmem:[%s5635_s12 + $0x40] ss:$8 sps:$4 sm:$0xff]  }
 0x2eb   : > { %v2168_v55 = vsel %vm2164_vm1, %v2161_v52, -inf }
 0x2ee   : > { %2169 = vmax.xlane.f32.xlu0 %v2168_v55  ;;  %v2146_v56 = vpop.f32.mrb[8].mxu0  ;;  %v4908_v55 = vld [vmem:[%s5635_s12 + $0x54] ss:$8 sps:$4 sm:$0xff]  }
 0x2ef   : > { %v2162_v57 = vadd.f32 %v4425_v50, %v2146_v56  ;;  %v4632_v59 = vpop.f32.mrb[9].mxu0  ;;  %v4906_v56 = vld [vmem:[%s5635_s12 + $0x50] ss:$8 sps:$4 sm:$0xff]  }
 0x2f0   : > { %v2149_v60 = vpop.f32.mrb[10].mxu0  ;;  %v4909_v59 = vld [vmem:[%s5635_s12 + $0x60] ss:$8 sps:$4 sm:$0xff]  }
 0x2f1   : > { %v2163_v61 = vadd.f32 %v4425_v50, %v2149_v60  ;;  %v4633_v62 = vpop.f32.mrb[11].mxu0  ;;  %v2171_v63 = vsel %vm2164_vm1, %v2162_v57, -inf  ;;  %v4914_v60 = vld [vmem:[%s5635_s12 + $0x74] ss:$8 sps:$4 sm:$0xff]  }
 0x2f2   : > { %2172 = vmax.xlane.f32.xlu1 %v2171_v63  ;;  %v4917_v62 = vld [vmem:[%s5635_s12 + $0x84] ss:$8 sps:$4 sm:$0xff]   ;;  %v4915_v63 = vld [vmem:[%s5635_s12 + $0x80] ss:$8 sps:$4 sm:$0xff]  }
 0x2f3   : > { %v2174_v0 = vsel %vm2164_vm1, %v2163_v61, -inf }
 0x2f6   : > { %2175 = vmax.xlane.f32.xlu1 %v2174_v0  ;;  %v4920_v0 = vld [vmem:[%s5635_s12 + $0x94] ss:$8 sps:$4 sm:$0xff]  }
 0x377   : > { %v2167_v1 = vpop.xlane.xlu0 %2166 }
 0x378   : > { %v2177_v2 = vsub.f32 %v2160_v48, %v2167_v1  ;;  %v4894_v48 = vld [vmem:[%s5635_s12 + $0x10] ss:$8 sps:$4 sm:$0xff]  }
 0x379   : > { %v4918_v1 = vld [vmem:[%s5635_s12 + $0x90] ss:$8 sps:$4 sm:$0xff]  }
 0x37a   : > { %v2181_v3 = vmul.f32 1.442695, %v2177_v2  ;;  %v4923_v2 = vld [vmem:[%s5635_s12 + $0xa4] ss:$8 sps:$4 sm:$0xff]  }
 0x37b   : > { %v2170_v4 = vpop.xlane.xlu0 %2169 }
 0x37c   : > { %5131 = vpow2.f32 %v2181_v3  ;;  %v2178_v5 = vsub.f32 %v2161_v52, %v2170_v4  ;;  %v4900_v52 = vld [vmem:[%s5635_s12 + $0x30] ss:$8 sps:$4 sm:$0xff]   ;;  %v4921_v3 = vld [vmem:[%s5635_s12 + $0xa0] ss:$8 sps:$4 sm:$0xff]   ;;  %v4926_v4 = vld [vmem:[%s5635_s12 + $0xb4] ss:$8 sps:$4 sm:$0xff]  }
 0x37e   : > { %v2183_v12 = vmul.f32 1.442695, %v2178_v5  ;;  %v4924_v5 = vld [vmem:[%s5635_s12 + $0xb0] ss:$8 sps:$4 sm:$0xff]  }
 0x37f   : > { %v2173_v13 = vpop.xlane.xlu1 %2172 }
 0x380   : > { %5133 = vpow2.f32 %v2183_v12  ;;  %v2179_v14 = vsub.f32 %v2162_v57, %v2173_v13  ;;  %v4911_v57 = vld [vmem:[%s5635_s12 + $0x64] ss:$8 sps:$4 sm:$0xff]   ;;  %v4927_v13 = vld [vmem:[%s5635_s12 + $0xc0] ss:$8 sps:$4 sm:$0xff]  }
 0x381   : > { %v4929_v12 = vld [vmem:[%s5635_s12 + $0xc4] ss:$8 sps:$4 sm:$0xff]  }
 0x382   : > { %v2185_v15 = vmul.f32 1.442695, %v2179_v14  ;;  %v4932_v14 = vld [vmem:[%s5635_s12 + $0xd4] ss:$8 sps:$4 sm:$0xff]  }
 0x383   : > { %v2176_v16 = vpop.xlane.xlu1 %2175 }
 0x384   : > { %5135 = vpow2.f32 %v2185_v15  ;;  %v2180_v17 = vsub.f32 %v2163_v61, %v2176_v16  ;;  %v4912_v61 = vld [vmem:[%s5635_s12 + $0x70] ss:$8 sps:$4 sm:$0xff]   ;;  %v4933_v16 = vld [vmem:[%s5635_s12 + $0xe0] ss:$8 sps:$4 sm:$0xff]  }
 0x385   : > { %v4930_v15 = vld [vmem:[%s5635_s12 + $0xd0] ss:$8 sps:$4 sm:$0xff]  }
 0x386   : > { %v5132_v18 = vpop.eup %5131  ;;  %v2187_v19 = vmul.f32 1.442695, %v2180_v17  ;;  %v4935_v17 = vld [vmem:[%s5635_s12 + $0xe4] ss:$8 sps:$4 sm:$0xff]  }
 0x387   : > { %v2189_v20 = vsel %vm2164_vm1, %v5132_v18, 0.0 }
 0x388   : > { %5137 = vpow2.f32 %v2187_v19  ;;  %2190 = vadd.xlane.f32.xlu0 %v2189_v20  ;;  %v4936_v19 = vld [vmem:[%s5635_s12 + $0xf0] ss:$8 sps:$4 sm:$0xff]  }
 0x38a   : > { %v5134_v21 = vpop.eup %5133 }
 0x38b   : > { %v2192_v22 = vsel %vm2164_vm1, %v5134_v21, 0.0 }
 0x38c   : > { %2193 = vadd.xlane.f32.xlu1 %v2192_v22 }
 0x38e   : > { %v5136_v23 = vpop.eup %5135 }
 0x38f   : > { %v2195_v24 = vsel %vm2164_vm1, %v5136_v23, 0.0 }
 0x390   : > { %2196 = vadd.xlane.f32.xlu0 %v2195_v24 }
 0x392   : > { %v5138_v25 = vpop.eup %5137 }
 0x393   : > { %v2198_v26 = vsel %vm2164_vm1, %v5138_v25, 0.0 }
 0x394   : > { %2199 = vadd.xlane.f32.xlu1 %v2198_v26 }
 0x415   : > { %v2191_v27 = vpop.xlane.xlu0 %2190 }
 0x416   : > { %5139 = vrcp.f32 %v2191_v27 }
 0x419   : > { %v2194_v30 = vpop.xlane.xlu1 %2193 }
 0x41a   : > { %5141 = vrcp.f32 %v2194_v30 }
 0x41d   : > { %v2197_v31 = vpop.xlane.xlu0 %2196 }
 0x41e   : > { %5143 = vrcp.f32 %v2197_v31 }
 0x420   : > { %v5140_v6 = vpop.eup %5139 }
 0x421   : > { %v2200_v32 = vpop.xlane.xlu1 %2199  ;;  %v2205_v34 = vmul.f32 %v5140_v6, %v5132_v18  ;;  %v4938_v18 = vld [vmem:[%s5635_s12 + $0xf4] ss:$8 sps:$4 sm:$0xff]  }
 0x422   : > { %5145 = vrcp.f32 %v2200_v32 }
 0x424   : > { %v5142_v33 = vpop.eup %5141 }
 0x425   : > { %v2206_v35 = vmul.f32 %v5142_v33, %v5134_v21 }
 0x427   : > { %v2209_v36 = vpack.c.bf16 %v2206_v35, %v2205_v34 }
 0x428   : > { %v5144_v37 = vpop.eup %5143 }
 0x429   : > { %4637 = vmatmul.mubr.msk.bf16.vlgmr.msra.gmra.mrb[8].mxu1 %vm2164_vm1, %v2209_v36  ;;  %v2207_v39 = vmul.f32 %v5144_v37, %v5136_v23 }
 0x42a   : > { %4641 = vmatpush3.bf16.msra.mxu1 %v5944_v42  ;;  %4642 = vmatprep.mubr.msk.bf16.mxu1 %vm5365_vm0, %v5364_v11  ;;  %v4899_v42 = vld [vmem:[%s5635_s12 + $0x24] ss:$8 sps:$4 sm:$0xff]  }
 0x42b   : > { %2735 = vmatprep.subr.bf16.mxu1 %v4893_v8 }
 0x42c   : > { %v5146_v38 = vpop.eup %5145 }
 0x42d   : > { %v2208_v40 = vmul.f32 %v5146_v38, %v5138_v25 }
 0x42f   : > { %v2210_v50 = vpack.c.bf16 %v2208_v40, %v2207_v39 }
 0x431   : > { %4643 = vmatmul.mubr.msk.bf16.vlgmr.msra.gmra.mrb[12].mxu1 %vm2164_vm1, %v2210_v50 }
 0x432   : > { %2736 = vmatpush1.bf16.msra.mxu1 %v4891_v41 }
 0x433   : > { %2737 = vmatprep.subr.bf16.mxu1 %v4896_v43 }
 0x436   : > { %2738 = vmatpush1.bf16.msra.mxu1 %v4894_v48 }
 0x437   : > { %2739 = vmatprep.subr.bf16.mxu1 %v4899_v42 }
 0x43a   : > { %2740 = vmatpush1.bf16.msra.mxu1 %v4897_v49 }
 0x43b   : > { %2741 = vmatprep.subr.bf16.mxu1 %v4902_v51 }
 0x43e   : > { %2742 = vmatpush1.bf16.msra.mxu1 %v4900_v52 }
 0x43f   : > { %2743 = vmatprep.subr.bf16.mxu1 %v4905_v53 }
 0x442   : > { %2744 = vmatpush1.bf16.msra.mxu1 %v4903_v54 }
 0x443   : > { %2745 = vmatprep.subr.bf16.mxu1 %v4908_v55 }
 0x446   : > { %2746 = vmatpush1.bf16.msra.mxu1 %v4906_v56 }
 0x447   : > { %2747 = vmatprep.subr.bf16.mxu1 %v4911_v57 }
 0x44a   : > { %2748 = vmatpush1.bf16.msra.mxu1 %v4909_v59 }
 0x44b   : > { %2749 = vmatprep.subr.bf16.mxu1 %v4914_v60 }
 0x44e   : > { %2750 = vmatpush1.bf16.msra.mxu1 %v4912_v61 }
 0x44f   : > { %2751 = vmatprep.subr.bf16.mxu1 %v4917_v62 }
 0x452   : > { %2752 = vmatpush1.bf16.msra.mxu1 %v4915_v63 }
 0x453   : > { %2753 = vmatprep.subr.bf16.mxu1 %v4920_v0 }
 0x456   : > { %2754 = vmatpush1.bf16.msra.mxu1 %v4918_v1 }
 0x457   : > { %2755 = vmatprep.subr.bf16.mxu1 %v4923_v2 }
 0x45a   : > { %2756 = vmatpush1.bf16.msra.mxu1 %v4921_v3 }
 0x45b   : > { %2757 = vmatprep.subr.bf16.mxu1 %v4926_v4 }
 0x45e   : > { %2758 = vmatpush1.bf16.msra.mxu1 %v4924_v5 }
 0x45f   : > { %2759 = vmatprep.subr.bf16.mxu1 %v4929_v12 }
 0x462   : > { %2760 = vmatpush1.bf16.msra.mxu1 %v4927_v13 }
 0x463   : > { %2761 = vmatprep.subr.bf16.mxu1 %v4932_v14 }
 0x466   : > { %2762 = vmatpush1.bf16.msra.mxu1 %v4930_v15 }
 0x467   : > { %2763 = vmatprep.subr.bf16.mxu1 %v4935_v17 }
 0x46a   : > { %2764 = vmatpush1.bf16.msra.mxu1 %v4933_v16 }
 0x46b   : > { %2765 = vmatprep.subr.bf16.mxu1 %v4938_v18 }
 0x46e   : > { %2766 = vmatpush1.bf16.msra.mxu1 %v4936_v19 }
 0x4fc   : > { %v2248_v20 = vpop.f32.mrb[8].mxu1 }
 0x4fd   : > { %v4638_v21 = vpop.f32.mrb[9].mxu1  ;;  %v2299_v24 = vcombine.high %v2248_v20, %v5364_v11  ;;  %v2306_v26 = vrot.slane %v2248_v20, %v5814_v58 }
 0x4fe   : > { %v2251_v22 = vpop.f32.mrb[10].mxu1 }
 0x4ff   : > { %v4639_v23 = vpop.f32.mrb[11].mxu1  ;;  %v2313_v32 = vrot.slane %v2299_v24, %v5814_v58  ;;  %v2365_v6 = vcombine.high %v2251_v22, %v5364_v11  ;;  %v2372_v38 = vrot.slane %v2251_v22, %v5814_v58 }
 0x501   : > { %v2379_v48 = vrot.slane %v2365_v6, %v5814_v58 }
 0x504   : > { %v2292_v25 = vpop.f32.mrb[12].mxu1 }
 0x505   : > { %v2314_v27 = vcombine.high %v2292_v25, %v5364_v11  ;;  %v2321_v30 = vrot.slane %v2292_v25, %v5814_v58  ;;  %v4644_v31 = vpop.f32.mrb[13].mxu1 }
 0x506   : > { %v2295_v33 = vpop.f32.mrb[14].mxu1 }
 0x507   : > { %v2328_v34 = vrot.slane %v2314_v27, %v5814_v58  ;;  %v2329_v35 = vcombine.low %v2306_v26, %v2321_v30  ;;  %v2330_v36 = vcombine.high %v2306_v26, %v2321_v30  ;;  %v2380_v8 = vcombine.high %v2295_v33, %v5364_v11  ;;  %v4645_v37 = vpop.f32.mrb[15].mxu1 }
 0x508   : > { %v2387_v39 = vrot.slane %v2295_v33, %v5814_v58  ;;  %v6033_v33 = vld [vmem:[%s5671_s9 + $0x8] sm:$0x3f] }
 0x509   : > { %v2337_v40 = vrot.slane %v2329_v35, %v5819_v7  ;;  %v2344_v41 = vrot.slane %v2330_v36, %v5819_v7  ;;  %v2345_v50 = vcombine.low %v2313_v32, %v2328_v34  ;;  %v2346_v43 = vcombine.high %v2313_v32, %v2328_v34 }
 0x50a   : > { %v2394_v42 = vrot.slane %v2380_v8, %v5814_v58  ;;  %v2395_v49 = vcombine.low %v2372_v38, %v2387_v39  ;;  %v2396_v51 = vcombine.high %v2372_v38, %v2387_v39  ;;  %v2574_v35 = vrot.slane %v6033_v33, %v5801_v47  ;;  %v5171_v39 = vld [vmem:[#allocation2] sm:$0xff] }
 0x50b   : > { %v2353_v52 = vrot.slane %v2345_v50, %v5819_v7  ;;  %v2360_v11 = vrot.slane %v2346_v43, %v5819_v7  ;;  %v2431_v53 = vcombine.low %v2337_v40, %v2344_v41  ;;  %v4428_v54 = vcombine.high %v2337_v40, %v2344_v41  ;;  %v5172_v43 = vld [vmem:[#allocation2 + $0x8] sm:$0xff] }
 0x50c   : > { %v2403_v55 = vrot.slane %v2395_v49, %v5819_v7  ;;  %v2410_v56 = vrot.slane %v2396_v51, %v5819_v7  ;;  %v2411_v57 = vcombine.low %v2379_v48, %v2394_v42  ;;  %v2412_v59 = vcombine.high %v2379_v48, %v2394_v42  ;;  %v5173_v49 = vld [vmem:[#allocation2 + $0x10] sm:$0xff] }
 0x50d   : > { %v2438_v60 = vrot.slane %v2431_v53, %v5814_v58  ;;  %v2446_v61 = vrot.slane %v4428_v54, %v5814_v58  ;;  %v2447_v62 = vcombine.low %v2353_v52, %v2360_v11  ;;  %v4429_v63 = vcombine.high %v2353_v52, %v2360_v11  ;;  %v5174_v52 = vld [vmem:[#allocation2 + $0x18] sm:$0xff] }
 0x50e   : > { %v2419_v0 = vrot.slane %v2411_v57, %v5819_v7  ;;  %v2426_v1 = vrot.slane %v2412_v59, %v5819_v7  ;;  %v2481_v2 = vcombine.low %v2403_v55, %v2410_v56  ;;  %v4430_v3 = vcombine.high %v2403_v55, %v2410_v56  ;;  %v4939_v55 = vld [vmem:[%s5643_s10] ss:$16 sps:$4 sm:$0xff]   ;;  %v4941_v56 = vld [vmem:[%s5643_s10 + $0x4] ss:$16 sps:$4 sm:$0xff]   ;;  %v4942_v57 = vld [vmem:[%s5643_s10 + $0x8] ss:$16 sps:$4 sm:$0xff]  }
 0x50f   : > { %v2454_v4 = vrot.slane %v2447_v62, %v5814_v58  ;;  %v2462_v5 = vrot.slane %v4429_v63, %v5814_v58  ;;  %v2463_v12 = vcombine.low %v2438_v60, %v2446_v61  ;;  %v4944_v59 = vld [vmem:[%s5643_s10 + $0xc] ss:$16 sps:$4 sm:$0xff]   ;;  %v4947_v60 = vld [vmem:[%s5643_s10 + $0x24] ss:$16 sps:$4 sm:$0xff]   ;;  %3247 = vmatprep.subr.bf16.mxu0 %v4941_v56  ;;  %v4945_v62 = vld [vmem:[%s5643_s10 + $0x20] ss:$16 sps:$4 sm:$0xff]  }
 0x510   : > { %v2488_v13 = vrot.slane %v2481_v2, %v5814_v58  ;;  %v2496_v14 = vrot.slane %v4430_v3, %v5814_v58  ;;  %v2497_v15 = vcombine.low %v2419_v0, %v2426_v1  ;;  %v4431_v16 = vcombine.high %v2419_v0, %v2426_v1  ;;  %v4950_v61 = vld [vmem:[%s5643_s10 + $0x2c] ss:$16 sps:$4 sm:$0xff]   ;;  %3290 = vmatprep.subr.bf16.mxu1 %v4944_v59  ;;  %v4948_v63 = vld [vmem:[%s5643_s10 + $0x28] ss:$16 sps:$4 sm:$0xff]   ;;  %v4953_v0 = vld [vmem:[%s5643_s10 + $0x44] ss:$16 sps:$4 sm:$0xff]  }
 0x511   : > { %v2471_v17 = vcombine.low %v2454_v4, %v2462_v5  ;;  %v2470_v21 = vrot.slane %v2463_v12, %v5819_v7  ;;  %3248 = vmatpush1.bf16.msra.mxu0 %v4939_v55  ;;  %v4956_v1 = vld [vmem:[%s5643_s10 + $0x4c] ss:$16 sps:$4 sm:$0xff]   ;;  %v4951_v2 = vld [vmem:[%s5643_s10 + $0x40] ss:$16 sps:$4 sm:$0xff]   ;;  %v4954_v3 = vld [vmem:[%s5643_s10 + $0x48] ss:$16 sps:$4 sm:$0xff]  }
 0x512   : > { %v2504_v18 = vrot.slane %v2497_v15, %v5814_v58  ;;  %v2512_v19 = vrot.slane %v4431_v16, %v5814_v58  ;;  %v2513_v20 = vcombine.low %v2488_v13, %v2496_v14  ;;  %v6030_v58 = vld [vmem:[%s5671_s9] sm:$0x3f]  ;;  %3249 = vmatprep.subr.bf16.mxu0 %v4947_v60  ;;  %v4960_v13 = vld [vmem:[%s5643_s10 + $0x68] ss:$16 sps:$4 sm:$0xff]  }
 0x513   : > { %v2478_v22 = vrot.slane %v2471_v17, %v5819_v7  ;;  %v2570_v34 = vrot.slane %v6030_v58, %v5801_v47  ;;  %v4959_v4 = vld [vmem:[%s5643_s10 + $0x64] ss:$16 sps:$4 sm:$0xff]   ;;  %v4962_v5 = vld [vmem:[%s5643_s10 + $0x6c] ss:$16 sps:$4 sm:$0xff]   ;;  %v4957_v12 = vld [vmem:[%s5643_s10 + $0x60] ss:$16 sps:$4 sm:$0xff]  }
 0x514   : > { %v2521_v23 = vcombine.low %v2504_v18, %v2512_v19  ;;  %v2520_v26 = vrot.slane %v2513_v20, %v5819_v7  ;;  %v4965_v14 = vld [vmem:[%s5643_s10 + $0x84] ss:$16 sps:$4 sm:$0xff]   ;;  %v4968_v15 = vld [vmem:[%s5643_s10 + $0x8c] ss:$16 sps:$4 sm:$0xff]   ;;  %v4963_v16 = vld [vmem:[%s5643_s10 + $0x80] ss:$16 sps:$4 sm:$0xff]  }
 0x515   : > { %v2480_v24 = vcombine.high %v2470_v21, %v2478_v22  ;;  %v2479_v25 = vcombine.low %v2470_v21, %v2478_v22  ;;  %3250 = vmatpush1.bf16.msra.mxu0 %v4945_v62  ;;  %v4966_v17 = vld [vmem:[%s5643_s10 + $0x88] ss:$16 sps:$4 sm:$0xff]   ;;  %v4971_v18 = vld [vmem:[%s5643_s10 + $0xa4] ss:$16 sps:$4 sm:$0xff]   ;;  %v4974_v19 = vld [vmem:[%s5643_s10 + $0xac] ss:$16 sps:$4 sm:$0xff]  }
 0x516   : > { %v2528_v27 = vrot.slane %v2521_v23, %v5819_v7  ;;  %3251 = vmatprep.subr.bf16.mxu0 %v4953_v0  ;;  %v4969_v20 = vld [vmem:[%s5643_s10 + $0xa0] ss:$16 sps:$4 sm:$0xff]   ;;  %v4972_v21 = vld [vmem:[%s5643_s10 + $0xa8] ss:$16 sps:$4 sm:$0xff]   ;;  %v4977_v22 = vld [vmem:[%s5643_s10 + $0xc4] ss:$16 sps:$4 sm:$0xff]  }
 0x517   : > { %v4980_v23 = vld [vmem:[%s5643_s10 + $0xcc] ss:$16 sps:$4 sm:$0xff]   ;;  %v5001_v55 = vld [vmem:[%s5643_s10 + $0x144] ss:$16 sps:$4 sm:$0xff]   ;;  %v5002_v59 = vld [vmem:[%s5643_s10 + $0x148] ss:$16 sps:$4 sm:$0xff]  }
 0x518   : > { %v2530_v30 = vcombine.high %v2520_v26, %v2528_v27  ;;  %v2529_v31 = vcombine.low %v2520_v26, %v2528_v27  ;;  %v4983_v26 = vld [vmem:[%s5643_s10 + $0xe4] ss:$16 sps:$4 sm:$0xff]   ;;  %v4986_v27 = vld [vmem:[%s5643_s10 + $0xec] ss:$16 sps:$4 sm:$0xff]   ;;  %v5005_v62 = vld [vmem:[%s5643_s10 + $0x160] ss:$16 sps:$4 sm:$0xff]  }
 0x519   : > { %3252 = vmatpush1.bf16.msra.mxu0 %v4951_v2  ;;  %v5004_v56 = vld [vmem:[%s5643_s10 + $0x14c] ss:$16 sps:$4 sm:$0xff]   ;;  %v5007_v60 = vld [vmem:[%s5643_s10 + $0x164] ss:$16 sps:$4 sm:$0xff]   ;;  %v5011_v2 = vld [vmem:[%s5643_s10 + $0x180] ss:$16 sps:$4 sm:$0xff]  }
 0x51a   : > { %v2534_v32 = vpack.c.bf16 %v2530_v30, %v2480_v24  ;;  %v2533_v6 = vpack.c.bf16 %v2529_v31, %v2479_v25  ;;  %3253 = vmatprep.subr.bf16.mxu0 %v4959_v4  ;;  %v4975_v24 = vld [vmem:[%s5643_s10 + $0xc0] ss:$16 sps:$4 sm:$0xff]   ;;  %v4978_v25 = vld [vmem:[%s5643_s10 + $0xc8] ss:$16 sps:$4 sm:$0xff]   ;;  %v5013_v0 = vld [vmem:[%s5643_s10 + $0x184] ss:$16 sps:$4 sm:$0xff]  }
 0x51b   : > { %v4981_v30 = vld [vmem:[%s5643_s10 + $0xe0] ss:$16 sps:$4 sm:$0xff]   ;;  %v4984_v31 = vld [vmem:[%s5643_s10 + $0xe8] ss:$16 sps:$4 sm:$0xff]   ;;  %v5019_v4 = vld [vmem:[%s5643_s10 + $0x1a4] ss:$16 sps:$4 sm:$0xff]  }
 0x51c   : > { %2767 = vmatprep.mubr.bf16.mxu1 %v2534_v32  ;;  %v4989_v32 = vld [vmem:[%s5643_s10 + $0x104] ss:$16 sps:$4 sm:$0xff]  }
 0x51d   : > { %2768 = vmatmul.mubr.bf16.vlgmr.msra.gmra.mrb[16].mxu1 %v2533_v6  ;;  %3254 = vmatpush1.bf16.msra.mxu0 %v4957_v12  ;;  %v4992_v6 = vld [vmem:[%s5643_s10 + $0x10c] ss:$16 sps:$4 sm:$0xff]   ;;  %v5017_v12 = vld [vmem:[%s5643_s10 + $0x1a0] ss:$16 sps:$4 sm:$0xff]  }
 0x51e   : > { %3291 = vmatpush1.bf16.msra.mxu1 %v4942_v57  ;;  %3255 = vmatprep.subr.bf16.mxu0 %v4965_v14  ;;  %v4999_v57 = vld [vmem:[%s5643_s10 + $0x140] ss:$16 sps:$4 sm:$0xff]   ;;  %v5025_v14 = vld [vmem:[%s5643_s10 + $0x1c4] ss:$16 sps:$4 sm:$0xff]  }
 0x51f   : > { %3292 = vmatprep.subr.bf16.mxu1 %v4950_v61  ;;  %v5010_v61 = vld [vmem:[%s5643_s10 + $0x16c] ss:$16 sps:$4 sm:$0xff]  }
 0x521   : > { %3256 = vmatpush1.bf16.msra.mxu0 %v4963_v16  ;;  %v5023_v16 = vld [vmem:[%s5643_s10 + $0x1c0] ss:$16 sps:$4 sm:$0xff]  }
 0x522   : > { %3293 = vmatpush1.bf16.msra.mxu1 %v4948_v63  ;;  %3257 = vmatprep.subr.bf16.mxu0 %v4971_v18  ;;  %v5008_v63 = vld [vmem:[%s5643_s10 + $0x168] ss:$16 sps:$4 sm:$0xff]   ;;  %v5031_v18 = vld [vmem:[%s5643_s10 + $0x1e4] ss:$16 sps:$4 sm:$0xff]  }
 0x523   : > { %3294 = vmatprep.subr.bf16.mxu1 %v4956_v1  ;;  %v5016_v1 = vld [vmem:[%s5643_s10 + $0x18c] ss:$16 sps:$4 sm:$0xff]  }
 0x525   : > { %3258 = vmatpush1.bf16.msra.mxu0 %v4969_v20  ;;  %v5029_v20 = vld [vmem:[%s5643_s10 + $0x1e0] ss:$16 sps:$4 sm:$0xff]  }
 0x526   : > { %3295 = vmatpush1.bf16.msra.mxu1 %v4954_v3  ;;  %3259 = vmatprep.subr.bf16.mxu0 %v4977_v22  ;;  %v5014_v3 = vld [vmem:[%s5643_s10 + $0x188] ss:$16 sps:$4 sm:$0xff]   ;;  %v5037_v22 = vld [vmem:[%s5687_s3 + $0x4] ss:$8 sps:$4 sm:$0xff]  }
 0x527   : > { %3296 = vmatprep.subr.bf16.mxu1 %v4962_v5  ;;  %v5022_v5 = vld [vmem:[%s5643_s10 + $0x1ac] ss:$16 sps:$4 sm:$0xff]  }
 0x529   : > { %3260 = vmatpush1.bf16.msra.mxu0 %v4975_v24 }
 0x52a   : > { %3297 = vmatpush1.bf16.msra.mxu1 %v4960_v13  ;;  %3261 = vmatprep.subr.bf16.mxu0 %v4983_v26  ;;  %v5020_v13 = vld [vmem:[%s5643_s10 + $0x1a8] ss:$16 sps:$4 sm:$0xff]  }
 0x52b   : > { %3298 = vmatprep.subr.bf16.mxu1 %v4968_v15  ;;  %v5028_v15 = vld [vmem:[%s5643_s10 + $0x1cc] ss:$16 sps:$4 sm:$0xff]  }
 0x52d   : > { %3262 = vmatpush1.bf16.msra.mxu0 %v4981_v30 }
 0x52e   : > { %3299 = vmatpush1.bf16.msra.mxu1 %v4966_v17  ;;  %3263 = vmatprep.subr.bf16.mxu0 %v4989_v32  ;;  %v5026_v17 = vld [vmem:[%s5643_s10 + $0x1c8] ss:$16 sps:$4 sm:$0xff]   ;;  %v2818_v32 = vrot.slane %v6030_v58, %v5807_v44 }
 0x52f   : > { %3300 = vmatprep.subr.bf16.mxu1 %v4974_v19  ;;  %v5034_v19 = vld [vmem:[%s5643_s10 + $0x1ec] ss:$16 sps:$4 sm:$0xff]  }
 0x532   : > { %3301 = vmatpush1.bf16.msra.mxu1 %v4972_v21  ;;  %v5032_v21 = vld [vmem:[%s5643_s10 + $0x1e8] ss:$16 sps:$4 sm:$0xff]  }
 0x533   : > { %3302 = vmatprep.subr.bf16.mxu1 %v4980_v23 }
 0x536   : > { %3303 = vmatpush1.bf16.msra.mxu1 %v4978_v25 }
 0x537   : > { %3304 = vmatprep.subr.bf16.mxu1 %v4986_v27 }
 0x53a   : > { %3305 = vmatpush1.bf16.msra.mxu1 %v4984_v31  ;;  %v2822_v31 = vrot.slane %v6033_v33, %v5807_v44 }
 0x53b   : > { %3306 = vmatprep.subr.bf16.mxu1 %v4992_v6 }
 0x5f0   : > { %v2769_v36 = vpop.f32.mrb[16].mxu1 }
 0x5f1   : > { %v2770_v8 = vadd.f32 %v2769_v36, %v2570_v34  ;;  %v2771_v37 = vpop.f32.mrb[17].mxu1  ;;  %v4995_v36 = vld [vmem:[%s5643_s10 + $0x124] ss:$16 sps:$4 sm:$0xff]  }
 0x5f2   : > { %v2772_v7 = vadd.f32 %v2771_v37, %v2574_v35  ;;  %v2773_v38 = vpop.f32.mrb[18].mxu1  ;;  %v4993_v37 = vld [vmem:[%s5643_s10 + $0x120] ss:$16 sps:$4 sm:$0xff]  }
 0x5f3   : > { %v6039_v40 = vadd.f32 %v5171_v39, %v2770_v8  ;;  %v2774_v41 = vadd.f32 %v2773_v38, %v2570_v34  ;;  %v2775_v50 = vpop.f32.mrb[19].mxu1  ;;  %v4987_v34 = vld [vmem:[%s5643_s10 + $0x100] ss:$16 sps:$4 sm:$0xff]   ;;  %v4998_v8 = vld [vmem:[%s5643_s10 + $0x12c] ss:$16 sps:$4 sm:$0xff]  }
 0x5f4   : > { %v6041_v48 = vadd.f32 %v5172_v43, %v2772_v7  ;;  %v2776_v42 = vadd.f32 %v2775_v50, %v2574_v35  ;;  %v4990_v35 = vld [vmem:[%s5643_s10 + $0x108] ss:$16 sps:$4 sm:$0xff]   ;;  %3264 = vmatpush1.bf16.msra.mxu0 %v4987_v34 }
 0x5f5   : > { %v6043_v51 = vadd.f32 %v5173_v49, %v2774_v41  ;;  %3307 = vmatpush1.bf16.msra.mxu1 %v4990_v35  ;;  %3265 = vmatprep.subr.bf16.mxu0 %v4995_v36  ;;  %v4996_v7 = vld [vmem:[%s5643_s10 + $0x128] ss:$16 sps:$4 sm:$0xff]  }
 0x5f6   : > { %v6045_v11 = vadd.f32 %v5174_v52, %v2776_v42  ;;  %v2782_v53 = vadd.f32 %v6041_v48, %v6039_v40  ;;  %3308 = vmatprep.subr.bf16.mxu1 %v4998_v8  ;;  %v2834_v8 = vrot.slane %v6033_v33, %v5856_v9 }
 0x5f8   : > { %2783 = vadd.xlane.f32.xlu0 %v2782_v53  ;;  %v2785_v54 = vadd.f32 %v6045_v11, %v6043_v51  ;;  %3266 = vmatpush1.bf16.msra.mxu0 %v4993_v37  ;;  %v2830_v37 = vrot.slane %v6030_v58, %v5856_v9 }
 0x5f9   : > { %3309 = vmatpush1.bf16.msra.mxu1 %v4996_v7  ;;  %3267 = vmatprep.subr.bf16.mxu0 %v5001_v55  ;;  %v5043_v55 = vld [vmem:[%s5687_s3 + $0x24] ss:$8 sps:$4 sm:$0xff]  }
 0x5fa   : > { %2786 = vadd.xlane.f32.xlu1 %v2785_v54  ;;  %3310 = vmatprep.subr.bf16.mxu1 %v5004_v56  ;;  %v5041_v56 = vld [vmem:[%s5687_s3 + $0x20] ss:$8 sps:$4 sm:$0xff]  }
 0x5fc   : > { %3268 = vmatpush1.bf16.msra.mxu0 %v4999_v57  ;;  %v5046_v57 = vld [vmem:[%s5687_s3 + $0x34] ss:$8 sps:$4 sm:$0xff]  }
 0x5fd   : > { %3311 = vmatpush1.bf16.msra.mxu1 %v5002_v59  ;;  %3269 = vmatprep.subr.bf16.mxu0 %v5007_v60  ;;  %v5044_v59 = vld [vmem:[%s5687_s3 + $0x30] ss:$8 sps:$4 sm:$0xff]   ;;  %v5049_v60 = vld [vmem:[%s5687_s3 + $0x44] ss:$8 sps:$4 sm:$0xff]  }
 0x5fe   : > { %3312 = vmatprep.subr.bf16.mxu1 %v5010_v61  ;;  %v5047_v61 = vld [vmem:[%s5687_s3 + $0x40] ss:$8 sps:$4 sm:$0xff]  }
 0x600   : > { %3270 = vmatpush1.bf16.msra.mxu0 %v5005_v62  ;;  %v5052_v62 = vld [vmem:[%s5687_s3 + $0x54] ss:$8 sps:$4 sm:$0xff]  }
 0x601   : > { %3313 = vmatpush1.bf16.msra.mxu1 %v5008_v63  ;;  %3271 = vmatprep.subr.bf16.mxu0 %v5013_v0  ;;  %v5050_v63 = vld [vmem:[%s5687_s3 + $0x50] ss:$8 sps:$4 sm:$0xff]   ;;  %v5055_v0 = vld [vmem:[%s5687_s3 + $0x64] ss:$8 sps:$4 sm:$0xff]  }
 0x602   : > { %3314 = vmatprep.subr.bf16.mxu1 %v5016_v1  ;;  %v5053_v1 = vld [vmem:[%s5687_s3 + $0x60] ss:$8 sps:$4 sm:$0xff]  }
 0x604   : > { %3272 = vmatpush1.bf16.msra.mxu0 %v5011_v2  ;;  %v5058_v2 = vld [vmem:[%s5687_s3 + $0x74] ss:$8 sps:$4 sm:$0xff]  }
 0x605   : > { %3315 = vmatpush1.bf16.msra.mxu1 %v5014_v3  ;;  %3273 = vmatprep.subr.bf16.mxu0 %v5019_v4  ;;  %v5056_v3 = vld [vmem:[%s5687_s3 + $0x70] ss:$8 sps:$4 sm:$0xff]   ;;  %v5061_v4 = vld [vmem:[%s5687_s3 + $0x84] ss:$8 sps:$4 sm:$0xff]  }
 0x606   : > { %3316 = vmatprep.subr.bf16.mxu1 %v5022_v5  ;;  %v5059_v5 = vld [vmem:[%s5687_s3 + $0x80] ss:$8 sps:$4 sm:$0xff]  }
 0x608   : > { %3274 = vmatpush1.bf16.msra.mxu0 %v5017_v12  ;;  %v5064_v12 = vld [vmem:[%s5687_s3 + $0x94] ss:$8 sps:$4 sm:$0xff]  }
 0x609   : > { %3317 = vmatpush1.bf16.msra.mxu1 %v5020_v13  ;;  %3275 = vmatprep.subr.bf16.mxu0 %v5025_v14  ;;  %v5062_v13 = vld [vmem:[%s5687_s3 + $0x90] ss:$8 sps:$4 sm:$0xff]   ;;  %v5067_v14 = vld [vmem:[%s5687_s3 + $0xa4] ss:$8 sps:$4 sm:$0xff]  }
 0x60a   : > { %3318 = vmatprep.subr.bf16.mxu1 %v5028_v15  ;;  %v5065_v15 = vld [vmem:[%s5687_s3 + $0xa0] ss:$8 sps:$4 sm:$0xff]  }
 0x60c   : > { %3276 = vmatpush1.bf16.msra.mxu0 %v5023_v16  ;;  %v5070_v16 = vld [vmem:[%s5687_s3 + $0xb4] ss:$8 sps:$4 sm:$0xff]  }
 0x60d   : > { %3319 = vmatpush1.bf16.msra.mxu1 %v5026_v17  ;;  %3277 = vmatprep.subr.bf16.mxu0 %v5031_v18  ;;  %v5068_v17 = vld [vmem:[%s5687_s3 + $0xb0] ss:$8 sps:$4 sm:$0xff]   ;;  %v5071_v18 = vld [vmem:[%s5687_s3 + $0xc0] ss:$8 sps:$4 sm:$0xff]  }
 0x60e   : > { %3320 = vmatprep.subr.bf16.mxu1 %v5034_v19  ;;  %v5073_v19 = vld [vmem:[%s5687_s3 + $0xc4] ss:$8 sps:$4 sm:$0xff]  }
 0x610   : > { %3278 = vmatpush1.bf16.msra.mxu0 %v5029_v20  ;;  %v5076_v20 = vld [vmem:[%s5687_s3 + $0xd4] ss:$8 sps:$4 sm:$0xff]  }
 0x611   : > { %3321 = vmatpush1.bf16.msra.mxu1 %v5032_v21  ;;  %3801 = vmatprep.subr.bf16.mxu0 %v5037_v22  ;;  %v5074_v21 = vld [vmem:[%s5687_s3 + $0xd0] ss:$8 sps:$4 sm:$0xff]   ;;  %v5079_v22 = vld [vmem:[%s5687_s3 + $0xe4] ss:$8 sps:$4 sm:$0xff]  }
 0x685   : > { %v2784_v38 = vpop.xlane.xlu0 %2783 }
 0x686   : > { %v2789_v39 = vmul.f32 0.00390625, %v2784_v38 }
 0x687   : > { %v2787_v41 = vpop.xlane.xlu1 %2786 }
 0x688   : > { %v6092_v50 = vsub.f32 %v6039_v40, %v2789_v39  ;;  %v6095_v43 = vsub.f32 %v6041_v48, %v2789_v39  ;;  %v2790_v42 = vmul.f32 0.00390625, %v2787_v41 }
 0x68a   : > { %v6098_v49 = vsub.f32 %v6043_v51, %v2790_v42  ;;  %v6101_v52 = vsub.f32 %v6045_v11, %v2790_v42  ;;  %v2795_v53 = vmul.f32 %v6092_v50, %v6092_v50  ;;  %v2796_v54 = vmul.f32 %v6095_v43, %v6095_v43 }
 0x68c   : > { %v2799_v40 = vadd.f32 %v2796_v54, %v2795_v53  ;;  %v2797_v48 = vmul.f32 %v6098_v49, %v6098_v49  ;;  %v2798_v51 = vmul.f32 %v6101_v52, %v6101_v52 }
 0x68e   : > { %2800 = vadd.xlane.f32.xlu0 %v2799_v40  ;;  %v2802_v11 = vadd.f32 %v2798_v51, %v2797_v48  ;;  %v5035_v48 = vld [vmem:[%s5687_s3] ss:$8 sps:$4 sm:$0xff]   ;;  %v5040_v51 = vld [vmem:[%s5687_s3 + $0x14] ss:$8 sps:$4 sm:$0xff]  }
 0x690   : > { %2803 = vadd.xlane.f32.xlu1 %v2802_v11  ;;  %v5038_v11 = vld [vmem:[%s5687_s3 + $0x10] ss:$8 sps:$4 sm:$0xff]  }
 0x71b   : > { %v2801_v23 = vpop.xlane.xlu0 %2800 }
 0x71c   : > { %v2805_v24 = vmul.f32 0.00390625, %v2801_v23  ;;  %v5077_v23 = vld [vmem:[%s5687_s3 + $0xe0] ss:$8 sps:$4 sm:$0xff]  }
 0x71d   : > { %v2804_v25 = vpop.xlane.xlu1 %2803 }
 0x71e   : > { %v2807_v26 = vadd.f32 1e-12, %v2805_v24  ;;  %v2806_v27 = vmul.f32 0.00390625, %v2804_v25  ;;  %v5082_v24 = vld [vmem:[%s5687_s3 + $0xf4] ss:$8 sps:$4 sm:$0xff]  }
 0x71f   : > { %v5080_v25 = vld [vmem:[%s5687_s3 + $0xf0] ss:$8 sps:$4 sm:$0xff]  }
 0x720   : > { %5147 = vrsqrt.f32 %v2807_v26  ;;  %v2808_v30 = vadd.f32 1e-12, %v2806_v27  ;;  %v5085_v26 = vld [vmem:[%s5687_s3 + $0x104] ss:$8 sps:$4 sm:$0xff]   ;;  %v2905_v27 = vld [vmem:[%s5681_s22] sm:$0xf] }
 0x722   : > { %5149 = vrsqrt.f32 %v2808_v30  ;;  %v2910_v30 = vrot.slane %v2905_v27, %v5801_v47 }
 0x72a   : > { %v5148_v6 = vpop.eup %5147 }
 0x72b   : > { %v2811_v34 = vmul.f32 %v5148_v6, %v6092_v50  ;;  %v2812_v35 = vmul.f32 %v5148_v6, %v6095_v43  ;;  %v2922_v6 = vrot.slane %v2905_v27, %v5859_v10 }
 0x72c   : > { %v5150_v36 = vpop.eup %5149 }
 0x72d   : > { %v2813_v7 = vmul.f32 %v5150_v36, %v6098_v49  ;;  %v2814_v38 = vmul.f32 %v5150_v36, %v6101_v52  ;;  %v2824_v39 = vmul.f32 %v2822_v31, %v2812_v35  ;;  %v2823_v41 = vmul.f32 %v2818_v32, %v2811_v34 }
 0x72f   : > { %v2826_v42 = vmul.f32 %v2822_v31, %v2814_v38  ;;  %v2825_v50 = vmul.f32 %v2818_v32, %v2813_v7  ;;  %v6148_v43 = vadd.f32 %v2834_v8, %v2824_v39  ;;  %v6152_v54 = vadd.f32 %v2830_v37, %v2823_v41 }
 0x730   : > { %v2918_v31 = vrot.slane %v2905_v27, %v5856_v9  ;;  %v2914_v32 = vrot.slane %v2905_v27, %v5807_v44 }
 0x731   : > { %v6150_v53 = vadd.f32 %v2834_v8, %v2826_v42  ;;  %v6154_v40 = vadd.f32 %v2830_v37, %v2825_v50 }
 0x733   : > { %v2840_v49 = vpack.c.bf16 %v6150_v53, %v6148_v43  ;;  %v2839_v52 = vpack.c.bf16 %v6154_v40, %v6152_v54 }
 0x735   : > { %3279 = vmatprep.mubr.bf16.mxu0 %v2840_v49  ;;  %3322 = vmatprep.mubr.bf16.mxu1 %v2840_v49 }
 0x736   : > { %3280 = vmatmul.mubr.bf16.vlgmr.msra.gmra.mrb[12].mxu0 %v2839_v52  ;;  %3323 = vmatmul.mubr.bf16.vlgmr.msra.gmra.mrb[20].mxu1 %v2839_v52 }
 0x737   : > { %3802 = vmatpush1.bf16.msra.mxu0 %v5035_v48 }
 0x738   : > { %3803 = vmatprep.subr.bf16.mxu0 %v5040_v51 }
 0x73b   : > { %3804 = vmatpush1.bf16.msra.mxu0 %v5038_v11 }
 0x73c   : > { %3805 = vmatprep.subr.bf16.mxu0 %v5043_v55 }
 0x73f   : > { %3806 = vmatpush1.bf16.msra.mxu0 %v5041_v56 }
 0x740   : > { %3807 = vmatprep.subr.bf16.mxu0 %v5046_v57 }
 0x743   : > { %3808 = vmatpush1.bf16.msra.mxu0 %v5044_v59 }
 0x744   : > { %3809 = vmatprep.subr.bf16.mxu0 %v5049_v60 }
 0x747   : > { %3810 = vmatpush1.bf16.msra.mxu0 %v5047_v61 }
 0x748   : > { %3811 = vmatprep.subr.bf16.mxu0 %v5052_v62 }
 0x74b   : > { %3812 = vmatpush1.bf16.msra.mxu0 %v5050_v63 }
 0x74c   : > { %3813 = vmatprep.subr.bf16.mxu0 %v5055_v0 }
 0x74f   : > { %3814 = vmatpush1.bf16.msra.mxu0 %v5053_v1 }
 0x750   : > { %3815 = vmatprep.subr.bf16.mxu0 %v5058_v2 }
 0x753   : > { %3816 = vmatpush1.bf16.msra.mxu0 %v5056_v3 }
 0x754   : > { %3817 = vmatprep.subr.bf16.mxu0 %v5061_v4 }
 0x757   : > { %3818 = vmatpush1.bf16.msra.mxu0 %v5059_v5 }
 0x758   : > { %3819 = vmatprep.subr.bf16.mxu0 %v5064_v12 }
 0x75b   : > { %3820 = vmatpush1.bf16.msra.mxu0 %v5062_v13 }
 0x75c   : > { %3821 = vmatprep.subr.bf16.mxu0 %v5067_v14 }
 0x75f   : > { %3822 = vmatpush1.bf16.msra.mxu0 %v5065_v15 }
 0x760   : > { %3823 = vmatprep.subr.bf16.mxu0 %v5070_v16 }
 0x763   : > { %3824 = vmatpush1.bf16.msra.mxu0 %v5068_v17 }
 0x764   : > { %3825 = vmatprep.subr.bf16.mxu0 %v5073_v19 }
 0x767   : > { %3826 = vmatpush1.bf16.msra.mxu0 %v5071_v18 }
 0x768   : > { %3827 = vmatprep.subr.bf16.mxu0 %v5076_v20 }
 0x76b   : > { %3828 = vmatpush1.bf16.msra.mxu0 %v5074_v21 }
 0x76c   : > { %3829 = vmatprep.subr.bf16.mxu0 %v5079_v22 }
 0x76f   : > { %3830 = vmatpush1.bf16.msra.mxu0 %v5077_v23 }
 0x770   : > { %3831 = vmatprep.subr.bf16.mxu0 %v5082_v24 }
 0x773   : > { %3832 = vmatpush1.bf16.msra.mxu0 %v5080_v25 }
 0x774   : > { %3844 = vmatprep.subr.bf16.mxu0 %v5085_v26 }
 0x809   : > { %v3281_v34 = vpop.f32.mrb[12].mxu0  ;;  %v3324_v35 = vpop.f32.mrb[20].mxu1 }
 0x80a   : > { %v6197_v36 = vadd.f32 %v3281_v34, %v2910_v30  ;;  %v6199_v8 = vadd.f32 %v3324_v35, %v2918_v31  ;;  %v3283_v37 = vpop.f32.mrb[13].mxu0  ;;  %v3326_v7 = vpop.f32.mrb[21].mxu1 }
 0x80b   : > { %v6201_v38 = vadd.f32 %v3283_v37, %v2914_v32  ;;  %v6203_v39 = vadd.f32 %v3326_v7, %v2922_v6  ;;  %v3285_v41 = vpop.f32.mrb[14].mxu0  ;;  %v3328_v42 = vpop.f32.mrb[22].mxu1 }
 0x80c   : > { %v3341_v9 = vmul.f32 0.044715, %v6197_v36  ;;  %v3343_v50 = vmul.f32 0.044715, %v6199_v8  ;;  %v3286_v49 = vadd.f32 %v3285_v41, %v2910_v30  ;;  %v3329_v52 = vadd.f32 %v3328_v42, %v2918_v31  ;;  %v3287_v48 = vpop.f32.mrb[15].mxu0  ;;  %v3330_v51 = vpop.f32.mrb[23].mxu1 }
 0x80d   : > { %v3342_v11 = vmul.f32 0.044715, %v6201_v38  ;;  %v3344_v55 = vmul.f32 0.044715, %v6203_v39  ;;  %v6209_v56 = vadd.f32 %v3287_v48, %v2914_v32  ;;  %v6211_v57 = vadd.f32 %v3330_v51, %v2922_v6 }
 0x80e   : > { %v3349_v59 = vmul.f32 %v3341_v9, %v6197_v36  ;;  %v3351_v60 = vmul.f32 %v3343_v50, %v6199_v8  ;;  %v3345_v61 = vmul.f32 0.044715, %v3286_v49  ;;  %v3347_v62 = vmul.f32 0.044715, %v3329_v52 }
 0x80f   : > { %v3350_v63 = vmul.f32 %v3342_v11, %v6201_v38  ;;  %v3352_v0 = vmul.f32 %v3344_v55, %v6203_v39  ;;  %v3346_v1 = vmul.f32 0.044715, %v6209_v56  ;;  %v3348_v2 = vmul.f32 0.044715, %v6211_v57 }
 0x810   : > { %v3357_v3 = vmul.f32 %v3349_v59, %v6197_v36  ;;  %v3359_v4 = vmul.f32 %v3351_v60, %v6199_v8  ;;  %v3353_v5 = vmul.f32 %v3345_v61, %v3286_v49  ;;  %v3355_v12 = vmul.f32 %v3347_v62, %v3329_v52 }
 0x811   : > { %v3358_v13 = vmul.f32 %v3350_v63, %v6201_v38  ;;  %v3354_v14 = vmul.f32 %v3346_v1, %v6209_v56  ;;  %v3356_v15 = vmul.f32 %v3348_v2, %v6211_v57  ;;  %v3360_v20 = vmul.f32 %v3352_v0, %v6203_v39 }
 0x812   : > { %v3365_v16 = vadd.f32 %v3357_v3, %v6197_v36  ;;  %v3367_v17 = vadd.f32 %v3359_v4, %v6199_v8  ;;  %v3361_v18 = vmul.f32 %v3353_v5, %v3286_v49  ;;  %v3363_v19 = vmul.f32 %v3355_v12, %v3329_v52 }
 0x813   : > { %v3362_v21 = vmul.f32 %v3354_v14, %v6209_v56  ;;  %v3364_v22 = vmul.f32 %v3356_v15, %v6211_v57  ;;  %v3366_v27 = vadd.f32 %v3358_v13, %v6201_v38  ;;  %v3368_v35 = vadd.f32 %v3360_v20, %v6203_v39 }
 0x814   : > { %v3373_v23 = vmul.f32 0.7978846, %v3365_v16  ;;  %v3375_v24 = vmul.f32 0.7978846, %v3367_v17  ;;  %v3369_v25 = vadd.f32 %v3361_v18, %v3286_v49  ;;  %v3371_v26 = vadd.f32 %v3363_v19, %v3329_v52 }
 0x815   : > { %v3370_v30 = vadd.f32 %v3362_v21, %v6209_v56  ;;  %v3374_v6 = vmul.f32 0.7978846, %v3366_v27  ;;  %v3372_v37 = vadd.f32 %v3364_v22, %v6211_v57  ;;  %v3376_v7 = vmul.f32 0.7978846, %v3368_v35  ;;  %v5083_v21 = vld [vmem:[%s5687_s3 + $0x100] ss:$8 sps:$4 sm:$0xff]  }
 0x816   : > { %5151 = vtanh.f32 %v3373_v23  ;;  %v3377_v31 = vmul.f32 0.7978846, %v3369_v25  ;;  %v3379_v32 = vmul.f32 0.7978846, %v3371_v26  ;;  %v3333_v55 = vmul.f32 0.5, %v6197_v36 }
 0x817   : > { %5153 = vtanh.f32 %v3375_v24  ;;  %v3378_v34 = vmul.f32 0.7978846, %v3370_v30  ;;  %v3380_v41 = vmul.f32 0.7978846, %v3372_v37  ;;  %v3337_v59 = vmul.f32 0.5, %v3286_v49 }
 0x818   : > { %5155 = vtanh.f32 %v3377_v31  ;;  %v3335_v62 = vmul.f32 0.5, %v6199_v8  ;;  %v3339_v63 = vmul.f32 0.5, %v3329_v52  ;;  %v3334_v2 = vmul.f32 0.5, %v6201_v38  ;;  %v5088_v24 = vld [vmem:[%s5687_s3 + $0x114] ss:$8 sps:$4 sm:$0xff]  }
 0x819   : > { %5157 = vtanh.f32 %v3379_v32  ;;  %v3338_v13 = vmul.f32 0.5, %v6209_v56  ;;  %v3336_v52 = vmul.f32 0.5, %v6203_v39  ;;  %v3340_v16 = vmul.f32 0.5, %v6211_v57  ;;  %v5086_v57 = vld [vmem:[%s5687_s3 + $0x110] ss:$8 sps:$4 sm:$0xff]  }
 0x81a   : > { %5159 = vtanh.f32 %v3374_v6  ;;  %v5091_v25 = vld [vmem:[%s5687_s3 + $0x124] ss:$8 sps:$4 sm:$0xff]   ;;  %v5089_v26 = vld [vmem:[%s5687_s3 + $0x120] ss:$8 sps:$4 sm:$0xff]   ;;  %v5094_v27 = vld [vmem:[%s5687_s3 + $0x134] ss:$8 sps:$4 sm:$0xff]  }
 0x81b   : > { %5161 = vtanh.f32 %v3378_v34  ;;  %v5092_v30 = vld [vmem:[%s5687_s3 + $0x130] ss:$8 sps:$4 sm:$0xff]   ;;  %v5097_v31 = vld [vmem:[%s5687_s3 + $0x144] ss:$8 sps:$4 sm:$0xff]   ;;  %v5095_v32 = vld [vmem:[%s5687_s3 + $0x140] ss:$8 sps:$4 sm:$0xff]  }
 0x81c   : > { %5163 = vtanh.f32 %v3376_v7  ;;  %v5100_v6 = vld [vmem:[%s5687_s3 + $0x154] ss:$8 sps:$4 sm:$0xff]   ;;  %v5098_v34 = vld [vmem:[%s5687_s3 + $0x150] ss:$8 sps:$4 sm:$0xff]   ;;  %v5103_v35 = vld [vmem:[%s5687_s3 + $0x164] ss:$8 sps:$4 sm:$0xff]  }
 0x81d   : > { %5165 = vtanh.f32 %v3380_v41  ;;  %v5101_v37 = vld [vmem:[%s5687_s3 + $0x160] ss:$8 sps:$4 sm:$0xff]   ;;  %v5106_v7 = vld [vmem:[%s5687_s3 + $0x174] ss:$8 sps:$4 sm:$0xff]   ;;  %v5104_v41 = vld [vmem:[%s5687_s3 + $0x170] ss:$8 sps:$4 sm:$0xff]  }
 0x820   : > { %v5152_v42 = vpop.eup %5151 }
 0x821   : > { %v5154_v9 = vpop.eup %5153  ;;  %v3389_v50 = vadd.f32 1.0, %v5152_v42  ;;  %v5109_v42 = vld [vmem:[%s5687_s3 + $0x184] ss:$8 sps:$4 sm:$0xff]  }
 0x822   : > { %v5156_v48 = vpop.eup %5155  ;;  %v3391_v51 = vadd.f32 1.0, %v5154_v9  ;;  %v5107_v9 = vld [vmem:[%s5687_s3 + $0x180] ss:$8 sps:$4 sm:$0xff]  }
 0x823   : > { %v5158_v11 = vpop.eup %5157  ;;  %v3393_v60 = vadd.f32 1.0, %v5156_v48  ;;  %v3397_v4 = vmul.f32 %v3389_v50, %v3333_v55  ;;  %v5112_v50 = vld [vmem:[%s5687_s3 + $0x194] ss:$8 sps:$4 sm:$0xff]   ;;  %v5110_v48 = vld [vmem:[%s5687_s3 + $0x190] ss:$8 sps:$4 sm:$0xff]  }
 0x824   : > { %v5160_v61 = vpop.eup %5159  ;;  %v3395_v0 = vadd.f32 1.0, %v5158_v11  ;;  %v6237_v36 = vmul.f32 %v3391_v51, %v3335_v62  ;;  %v5115_v51 = vld [vmem:[%s5687_s3 + $0x1a4] ss:$8 sps:$4 sm:$0xff]   ;;  %v5113_v11 = vld [vmem:[%s5687_s3 + $0x1a0] ss:$8 sps:$4 sm:$0xff]  }
 0x825   : > { %v5162_v1 = vpop.eup %5161  ;;  %v3390_v3 = vadd.f32 1.0, %v5160_v61  ;;  %v3401_v5 = vmul.f32 %v3393_v60, %v3337_v59  ;;  %v5118_v55 = vld [vmem:[%s5687_s3 + $0x1b4] ss:$8 sps:$4 sm:$0xff]   ;;  %v5116_v59 = vld [vmem:[%s5687_s3 + $0x1b0] ss:$8 sps:$4 sm:$0xff]  }
 0x826   : > { %v5164_v12 = vpop.eup %5163  ;;  %v3394_v14 = vadd.f32 1.0, %v5162_v1  ;;  %v6239_v49 = vmul.f32 %v3395_v0, %v3339_v63  ;;  %v5121_v60 = vld [vmem:[%s5687_s3 + $0x1c4] ss:$8 sps:$4 sm:$0xff]   ;;  %v5119_v61 = vld [vmem:[%s5687_s3 + $0x1c0] ss:$8 sps:$4 sm:$0xff]  }
 0x827   : > { %v5166_v15 = vpop.eup %5165  ;;  %v3405_v8 = vpack.c.bf16 %v3401_v5, %v3397_v4  ;;  %v3392_v38 = vadd.f32 1.0, %v5164_v12  ;;  %v3398_v17 = vmul.f32 %v3390_v3, %v3334_v2  ;;  %v5124_v62 = vld [vmem:[%s5687_s3 + $0x1d4] ss:$8 sps:$4 sm:$0xff]   ;;  %v5122_v63 = vld [vmem:[%s5687_s3 + $0x1d0] ss:$8 sps:$4 sm:$0xff]   ;;  %v3476_v4 = vrot.slane %v6030_v58, %v5859_v10 }
 0x828   : > { %v3402_v18 = vmul.f32 %v3394_v14, %v3338_v13  ;;  %v3396_v19 = vadd.f32 1.0, %v5166_v15  ;;  %v3407_v56 = vpack.c.bf16 %v6239_v49, %v6237_v36  ;;  %v5127_v0 = vld [vmem:[%s5687_s3 + $0x1e4] ss:$8 sps:$4 sm:$0xff]   ;;  %v5125_v1 = vld [vmem:[%s5687_s3 + $0x1e0] ss:$8 sps:$4 sm:$0xff]   ;;  %v3480_v5 = vrot.slane %v6033_v33, %v5859_v10 }
 0x829   : > { %v3400_v22 = vmul.f32 %v3392_v38, %v3336_v52  ;;  %v5130_v2 = vld [vmem:[%s5687_s3 + $0x1f4] ss:$8 sps:$4 sm:$0xff]   ;;  %v5128_v3 = vld [vmem:[%s5687_s3 + $0x1f0] ss:$8 sps:$4 sm:$0xff]   ;;  %s4593_s3 = sshll.u32 (!%p4592_p5), %s5342_s30, 7 }
 0x82a   : > { %v3406_v20 = vpack.c.bf16 %v3402_v18, %v3398_v17  ;;  %v3404_v23 = vmul.f32 %v3396_v19, %v3340_v16  ;;  %s3956_s9 = sld [smem:[#allocation4 + %s4593_s3]] (!%p4592_p5)  ;;  %s3966_s12 = sadd.s32 (!%p4592_p5), 1, %s4593_s3 }
 0x82b   : > { %s3967_s28 = sld [smem:[#allocation4 + %s3966_s12]] (!%p4592_p5)  ;;  %s3977_s10 = sadd.s32 (!%p4592_p5), 2, %s4593_s3 }
 0x82c   : > { %3833 = vmatprep.mubr.bf16.mxu0 %v3406_v20  ;;  %v3408_v39 = vpack.c.bf16 %v3404_v23, %v3400_v22  ;;  %s3978_s0 = sld [smem:[#allocation4 + %s3977_s10]] (!%p4592_p5)  ;;  %s3988_s22 = sadd.s32 (!%p4592_p5), 3, %s4593_s3 }
 0x82d   : > { %3834 = vmatmul.mubr.bf16.vlgmr.msra.gmra.mrb[16].mxu0 %v3405_v8  ;;  %s6297_s16 = sld [smem:[#allocation4 + %s3988_s22]] (!%p4592_p5) }
 0x82e   : > { %3845 = vmatpush1.bf16.msra.mxu0 %v5083_v21  ;;  %3876 = vmatprep.mubr.bf16.mxu0 %v3408_v39 }
 0x82f   : > { %3846 = vmatprep.subr.bf16.mxu0 %v5088_v24 }
 0x830   : > { %s3957_s21 = sshra.s32 (!%p4592_p5), %s3956_s9, 3  ;;  %s3960_s18 = sand.u32 (!%p4592_p5), 7, %s3956_s9 }
 0x831   : > { %s4610_s13 = sshll.u32 (!%p4592_p5), %s3957_s21, 4  ;;  %s3968_s17 = sshra.s32 (!%p4592_p5), %s3967_s28, 3 }
 0x832   : > { %3847 = vmatpush1.bf16.msra.mxu0 %v5086_v57  ;;  %s3963_s7 = sadd.s32 (!%p4592_p5), %s4610_s13, %s3960_s18  ;;  %s3971_s29 = sand.u32 (!%p4592_p5), 7, %s3967_s28 }
 0x833   : > { %3848 = vmatprep.subr.bf16.mxu0 %v5091_v25  ;;  %s4611_s27 = sshll.u32 (!%p4592_p5), %s3968_s17, 4  ;;  %s3964_s30 = scalar_lea.vmem (!%p4592_p5), [#allocation2], %s3963_s7 }
 0x834   : > { %s3974_s26 = sadd.s32 (!%p4592_p5), %s4611_s27, %s3971_s29  ;;  %s3979_s20 = sshra.s32 (!%p4592_p5), %s3978_s0, 3 }
 0x835   : > { %s3982_s23 = sand.u32 (!%p4592_p5), 7, %s3978_s0  ;;  %s3975_s14 = scalar_lea.vmem (!%p4592_p5), [#allocation2], %s3974_s26 }
 0x836   : > { %3849 = vmatpush1.bf16.msra.mxu0 %v5089_v26  ;;  %s4612_s24 = sshll.u32 (!%p4592_p5), %s3979_s20, 4  ;;  %s3990_s1 = sshra.s32 (!%p4592_p5), %s6297_s16, 3 }
 0x837   : > { %3850 = vmatprep.subr.bf16.mxu0 %v5094_v27  ;;  %s3985_s5 = sadd.s32 (!%p4592_p5), %s4612_s24, %s3982_s23  ;;  %s3993_s11 = sand.u32 (!%p4592_p5), 7, %s6297_s16 }
 0x838   : > { %s4613_s3 = sshll.u32 (!%p4592_p5), %s3990_s1, 4  ;;  %s6398_s28 = sld [smem:[#allocation26_spill]] (!%p4592_p5) }
 0x839   : > { %s3986_s10 = scalar_lea.vmem (!%p4592_p5), [#allocation2], %s3985_s5  ;;  %s3996_s0 = sadd.s32 (!%p4592_p5), %s4613_s3, %s3993_s11 }
 0x83a   : > { %3851 = vmatpush1.bf16.msra.mxu0 %v5092_v30  ;;  %s3997_s22 = scalar_lea.vmem (!%p4592_p5), [#allocation2], %s3996_s0 }
 0x83b   : > { %3852 = vmatprep.subr.bf16.mxu0 %v5097_v31 }
 0x83e   : > { %3853 = vmatpush1.bf16.msra.mxu0 %v5095_v32 }
 0x83f   : > { %3854 = vmatprep.subr.bf16.mxu0 %v5100_v6 }
 0x842   : > { %3855 = vmatpush1.bf16.msra.mxu0 %v5098_v34 }
 0x843   : > { %3856 = vmatprep.subr.bf16.mxu0 %v5103_v35  ;;  %v3926_v35 = vrot.slane %v6030_v58, %v5903_v28 }
 0x846   : > { %3857 = vmatpush1.bf16.msra.mxu0 %v5101_v37  ;;  %v3930_v37 = vrot.slane %v6033_v33, %v5903_v28 }
 0x847   : > { %3858 = vmatprep.subr.bf16.mxu0 %v5106_v7 }
 0x84a   : > { %3859 = vmatpush1.bf16.msra.mxu0 %v5104_v41  ;;  %v3938_v41 = vrot.slane %v6030_v58, %v5906_v29 }
 0x84b   : > { %3860 = vmatprep.subr.bf16.mxu0 %v5109_v42  ;;  %v3942_v42 = vrot.slane %v6033_v33, %v5906_v29  ;;  %v5368_v29 = vmov (!%p4592_p5), 0  }
 0x84c   : > { %5175 = vset.pattern.permute.xlu0 (!%p4592_p5), %v5368_v29 }
 0x84e   : > { %3861 = vmatpush1.bf16.msra.mxu0 %v5107_v9 }
 0x84f   : > { %3862 = vmatprep.subr.bf16.mxu0 %v5112_v50 }
 0x852   : > { %3863 = vmatpush1.bf16.msra.mxu0 %v5110_v48 }
 0x853   : > { %3864 = vmatprep.subr.bf16.mxu0 %v5115_v51 }
 0x856   : > { %3865 = vmatpush1.bf16.msra.mxu0 %v5113_v11 }
 0x857   : > { %3866 = vmatprep.subr.bf16.mxu0 %v5118_v55 }
 0x85a   : > { %3867 = vmatpush1.bf16.msra.mxu0 %v5116_v59 }
 0x85b   : > { %3868 = vmatprep.subr.bf16.mxu0 %v5121_v60 }
 0x85e   : > { %3869 = vmatpush1.bf16.msra.mxu0 %v5119_v61 }
 0x85f   : > { %3870 = vmatprep.subr.bf16.mxu0 %v5124_v62 }
 0x862   : > { %3871 = vmatpush1.bf16.msra.mxu0 %v5122_v63 }
 0x863   : > { %3872 = vmatprep.subr.bf16.mxu0 %v5127_v0 }
 0x866   : > { %3873 = vmatpush1.bf16.msra.mxu0 %v5125_v1 }
 0x867   : > { %3874 = vmatprep.subr.bf16.mxu0 %v5130_v2 }
 0x86a   : > { %3875 = vmatpush1.bf16.msra.mxu0 %v5128_v3 }
 0x86d   : > { %3877 = vmatmul.mubr.bf16.vlgmr.msra.gmra.mrb[16].mxu0 %v3407_v56 }
 0x940   : > { %v3878_v12 = vpop.f32.mrb[16].mxu0 }
 0x941   : > { %v4646_v13 = vadd.f32 %v3878_v12, %v3476_v4  ;;  %v3880_v14 = vpop.f32.mrb[17].mxu0 }
 0x942   : > { %v4647_v15 = vadd.f32 %v3880_v14, %v3480_v5  ;;  %v3882_v8 = vpop.f32.mrb[18].mxu0 }
 0x943   : > { %v3887_v52 = vadd.f32 %v4646_v13, %v6152_v54  ;;  %v4648_v16 = vadd.f32 %v3882_v8, %v3476_v4  ;;  %v3884_v38 = vpop.f32.mrb[19].mxu0 }
 0x944   : > { %v3888_v17 = vadd.f32 %v4647_v15, %v6148_v43  ;;  %v4649_v18 = vadd.f32 %v3884_v38, %v3480_v5  ;;  %v4052_v5 = vld [vmem:[%s6398_s28] sm:$0x3] (!%p4592_p5) }
 0x945   : > { %v3889_v36 = vadd.f32 %v4648_v16, %v6154_v40  ;;  %v4057_v16 = vrot.slane (!%p4592_p5), %v4052_v5, %v5801_v47  ;;  %v4061_v38 = vrot.slane (!%p4592_p5), %v4052_v5, %v5807_v44 }
 0x946   : > { %v3890_v49 = vadd.f32 %v4649_v18, %v6150_v53  ;;  %v3891_v19 = vadd.f32 %v3888_v17, %v3887_v52 }
 0x948   : > { %3892 = vadd.xlane.f32.xlu0 %v3891_v19  ;;  %v3894_v56 = vadd.f32 %v3890_v49, %v3889_v36 }
 0x94a   : > { %3895 = vadd.xlane.f32.xlu1 %v3894_v56 }
 0x9d5   : > { %v3893_v10 = vpop.xlane.xlu0 %3892 }
 0x9d6   : > { %v3897_v20 = vmul.f32 0.00390625, %v3893_v10 }
 0x9d7   : > { %v3896_v21 = vpop.xlane.xlu1 %3895 }
 0x9d8   : > { %v3899_v22 = vsub.f32 %v3887_v52, %v3897_v20  ;;  %v3900_v23 = vsub.f32 %v3888_v17, %v3897_v20  ;;  %v3898_v24 = vmul.f32 0.00390625, %v3896_v21 }
 0x9da   : > { %v3901_v54 = vsub.f32 %v3889_v36, %v3898_v24  ;;  %v3902_v39 = vsub.f32 %v3890_v49, %v3898_v24  ;;  %v3903_v57 = vmul.f32 %v3899_v22, %v3899_v22  ;;  %v3904_v25 = vmul.f32 %v3900_v23, %v3900_v23  ;;  %v4072_v24 = vld [vmem:[#allocation5] sm:$0x1] (!%p4592_p5) }
 0x9dc   : > { %v3907_v43 = vadd.f32 %v3904_v25, %v3903_v57  ;;  %v3905_v26 = vmul.f32 %v3901_v54, %v3901_v54  ;;  %v3906_v27 = vmul.f32 %v3902_v39, %v3902_v39 }
 0x9de   : > { %3908 = vadd.xlane.f32.xlu0 %v3907_v43  ;;  %v3910_v40 = vadd.f32 %v3906_v27, %v3905_v26  ;;  %v4091_v27 = vand.u32 (!%p4592_p5), 127, %v726_v45 }
 0x9e0   : > { %3911 = vadd.xlane.f32.xlu1 %v3910_v40  ;;  %v4094_v40 = vsub.s32 (!%p4592_p5), %v4091_v27, %v5798_v46 }
 0xa6b   : > { %v3909_v53 = vpop.xlane.xlu0 %3908 }
 0xa6c   : > { %v3913_v30 = vmul.f32 0.00390625, %v3909_v53 }
 0xa6d   : > { %v3912_v31 = vpop.xlane.xlu1 %3911 }
 0xa6e   : > { %v3915_v32 = vadd.f32 1e-12, %v3913_v30  ;;  %v3914_v6 = vmul.f32 0.00390625, %v3912_v31 }
 0xa70   : > { %5167 = vrsqrt.f32 %v3915_v32  ;;  %v3916_v34 = vadd.f32 1e-12, %v3914_v6 }
 0xa72   : > { %5169 = vrsqrt.f32 %v3916_v34 }
 0xa7a   : > { %v5168_v7 = vpop.eup %5167 }
 0xa7b   : > { %v3919_v9 = vmul.f32 %v5168_v7, %v3899_v22  ;;  %v3920_v50 = vmul.f32 %v5168_v7, %v3900_v23 }
 0xa7c   : > { %v5170_v48 = vpop.eup %5169 }
 0xa7d   : > { %v3931_v51 = vmul.f32 %v3926_v35, %v3919_v9  ;;  %v3932_v11 = vmul.f32 %v3930_v37, %v3920_v50  ;;  %v3921_v55 = vmul.f32 %v5170_v48, %v3901_v54  ;;  %v3922_v59 = vmul.f32 %v5170_v48, %v3902_v39  ;;  %3954 = sbr.rel (%p4592_p5) target bundleno = 2893 (0xb4d), region = 84 }
 0xa7f   : > { %v3943_v60 = vadd.f32 %v3938_v41, %v3931_v51  ;;  %v3944_v61 = vadd.f32 %v3942_v42, %v3932_v11  ;;  %v3933_v62 = vmul.f32 %v3926_v35, %v3921_v55  ;;  %v3934_v63 = vmul.f32 %v3930_v37, %v3922_v59 }
 0xa81   : > { %3947 = vst [vmem:[#allocation2] sm:$0xff] %v3943_v60  ;;  %3948 = vst [vmem:[#allocation2 + $0x8] sm:$0xff] %v3944_v61  ;;  %v3945_v28 = vadd.f32 %v3938_v41, %v3933_v62  ;;  %v3946_v0 = vadd.f32 %v3942_v42, %v3934_v63 }
 0xa83   : > { %3949 = vst [vmem:[#allocation2 + $0x10] sm:$0xff] %v3945_v28  ;;  %3950 = vst [vmem:[#allocation2 + $0x18] sm:$0xff] %v3946_v0 }
 0xa8a   : > { %v3965_v58 = vld [vmem:[%s3964_s30] ss:$8 sm:$0x3] }
 0xa8b   : > { %v4003_v33 = vrot.slane %v3965_v58, %v5801_v47  ;;  %v4007_v1 = vrot.slane %v3965_v58, %v5807_v44  ;;  %v3976_v2 = vld [vmem:[%s3975_s14] ss:$8 sm:$0x3] }
 0xa8c   : > { %v4014_v3 = vrot.slane %v3976_v2, %v5801_v47  ;;  %v4018_v4 = vrot.slane %v3976_v2, %v5807_v44  ;;  %v3987_v12 = vld [vmem:[%s3986_s10] ss:$8 sm:$0x3] }
 0xa8d   : > { %v4025_v15 = vrot.slane %v3987_v12, %v5801_v47  ;;  %v4029_v8 = vrot.slane %v3987_v12, %v5807_v44  ;;  %v3998_v52 = vld [vmem:[%s3997_s22] ss:$8 sm:$0x3] }
 0xa8e   : > { %v4044_v13 = vsel %vm4043_vm2, %v4003_v33, %v4014_v3  ;;  %v4045_v14 = vsel %vm4043_vm2, %v4007_v1, %v4018_v4  ;;  %v4036_v17 = vrot.slane %v3998_v52, %v5801_v47  ;;  %v4040_v18 = vrot.slane %v3998_v52, %v5807_v44 }
 0xa8f   : > { %v4047_v36 = vsel %vm4046_vm3, %v4044_v13, %v4025_v15  ;;  %v4048_v49 = vsel %vm4046_vm3, %v4045_v14, %v4029_v8 }
 0xa90   : > { %v4050_v19 = vsel %vm4049_vm4, %v4047_v36, %v4036_v17  ;;  %v4051_v56 = vsel %vm4049_vm4, %v4048_v49, %v4040_v18 }
 0xa91   : > { %v4064_v10 = vmul.f32 %v4057_v16, %v4050_v19  ;;  %v4065_v20 = vmul.f32 %v4061_v38, %v4051_v56 }
 0xa93   : > { %v4067_v21 = vsel %vm4066_vm5, %v4064_v10, 0.0  ;;  %v4068_v22 = vsel %vm4066_vm5, %v4065_v20, 0.0 }
 0xa94   : > { %v4069_v23 = vadd.f32 %v4068_v22, %v4067_v21 }
 0xa96   : > { %4070 = vadd.xlane.f32.xlu0 %v4069_v23 }
 0xaac   : > { %4075 = vperm.xlu0 %5175, %v4072_v24  }
 0xb23   : > { %v4071_v54 = vpop.xlane.xlu0 %4070 }
 0xb2b   : > { %v4076_v39 = vpop.permute.xlu0 %4075 }
 0xb2c   : > { %v4081_v57 = vrot.slane %v4076_v39, %v5801_v47 }
 0xb2e   : > { %v4082_v25 = vadd.f32 %v4081_v57, %v4071_v54 }
 0xb30   : > { %v4602_v44 = vmul.f32 -1.442695, %v4082_v25 }
 0xb32   : > { %5176 = vpow2.f32 %v4602_v44 }
 0xb3c   : > { %v5177_v43 = vpop.eup %5176 }
 0xb3d   : > { %v4086_v26 = vadd.f32 1.0, %v5177_v43 }
 0xb3f   : > { %5178 = vrcp.f32 %v4086_v26 }
 0xb49   : > { %v5179_v53 = vpop.eup %5178 }
 0xb4a   : > { %v4095_v30 = vrot.slane %v5179_v53, %v4094_v40 }
 0xb4c   : > { %4098 = vst.msk [vmem:[%s608_s25] sm:$0x1] %vm4097_vm6, %v4095_v30 }
 0xb4d PF: > { %s36_s15 = sadd.s32 1, %s5354_s15   ;;  %s6400_s0 = sld [smem:[#allocation14_spill]] }
 0xb4e   : > { %p33_p9 = scmp.ge.s32.totalorder %s36_s15, 6   ;;  %s6401_s11 = sld [smem:[#allocation15_spill]] }
 0xb4f   : > { %s6402_s28 = sld [smem:[#allocation20_spill]]  ;;  %s6403_s29 = sld [smem:[#allocation16_spill]] }
 0xb50   : > { %s6404_s30 = sld [smem:[#allocation17_spill]]  ;;  %s6405_s13 = sld [smem:[#allocation18_spill]] }
 0xb51   : > { %s6406_s14 = sld [smem:[#allocation19_spill]]  ;;  %35 = sbr.rel (!%p33_p9) target bundleno = 24 (0x18), region = 158 }
 0xb58   :  { %4116 = vsyncpa [#allocation7], 1 }
 0xb59   :  { %4118 = vsyncpa [#allocation7 + $0x1], 1 }
 0xb5a   :  { %4119 = vsyncpa [#allocation9], 1 }
 0xb5b   :  { %4121 = vsyncpa [#allocation9 + $0x1], 1 }

</bundles_post_ra>
